<compile_context>
chip_gen: v6e
topology: v6e:2x2x1
jax: 0.10.0
libtpu: 0.0.40
codegen_flags: <defaults>
</compile_context>

<pallas_src>
import functools
import math

import jax
import jax.numpy as jnp
import numpy as np
from jax.experimental import pallas as pl
from jax.experimental.pallas import tpu as pltpu  # noqa: F401  (kept for TPU-specific tuning hooks)

SEQ = 77          # CLIP context length (hard-coded: prompt_token has 77 columns)
N_CTX = 4         # cfg.design_details.maple_length
CTX_DIM = 512     # clip_model.ln_final.weight.shape[0]
PROJ_DIM = 768    # nn.Linear(ctx_dim, 768)
VOCAB = 64        # synthetic token-embedding vocabulary (small, deterministic)
DEPTH = 3         # cfg.design_details.compound_prompts_depth
B = 2             # batch of text prompts
TRUNC = SEQ - N_CTX - 1

LANES = 128       # lane tile; also the padded one-hot width (VOCAB + N_CTX = 68 -> 128)
SUBL = 8          # sublane tile; batch rows padded to 8
VPAD = 128        # padded augmented-embedding-table rows
SEQ_PAD = 80      # per-row positions kept for the embedding matmul (77 -> 80, multiple of 8)


# ---------------------------------------------------------------------------
# Single fused kernel (no grid): prompt-token construction, embedding lookup
# (one one-hot MXU matmul for the whole batch, ctx overwrite folded in),
# proj(ctx) and the shared compound projection (bf16 operands, f32 accumulate).
# ---------------------------------------------------------------------------
def _fused_kernel(tok_ref, table_ref, comp_ref, pw_ref, pb_ref, cw_ref, cb_ref,
                  pe_ref, pt_ref, proj_ref, *, bsz):
    # tok_ref:   (8, 128)        int32  tokens, rows [0,bsz) and lanes [0,77) valid, rest 0
    # table_ref: (128, 512)      f32    rows [0,64)=token embeddings, [64,68)=ctx, rest 0
    # comp_ref:  (8, 512)        bf16   flattened compound_prompts_text (zero-padded rows)
    # pw/cw:     (512, 768)      bf16   pre-transposed Linear weights
    # pb/cb:     (1, 768)        f32    biases
    # pe_ref:    (bsz*80, 512)   f32    prompt embeddings (positions 77..79 are junk, sliced off)
    # pt_ref:    (8, 128)        f32    prompt tokens (float, as in PyTorch), padded tile
    # proj_ref:  (16, 768)       f32    rows 0..3 proj(ctx), rows 8..15 visual_deep_prompts
    tok_i = tok_ref[...]                                        # (8, 128) int32
    tok_f = tok_i.astype(jnp.float32)
    lane = jax.lax.broadcasted_iota(jnp.int32, tok_i.shape, 1)

    # ---- prompt_token: lane shift folded into a tiny permutation matmul (idle MXU) ------
    # M[k, j] = 1 iff prompt_token position j reads token position k:
    #   j == 0            -> k == 0               (SOT kept)
    #   1 <= j <= n_ctx   -> no source            (ctx slots, zero)
    #   n_ctx < j < 77    -> k == j - n_ctx       (truncated sentence copy)
    #   j >= 77           -> no source            (padding)
    row = jax.lax.broadcasted_iota(jnp.int32, (LANES, LANES), 0)
    col = jax.lax.broadcasted_iota(jnp.int32, (LANES, LANES), 1)
    shift_m = (((col == 0) & (row == 0))
               | ((col > N_CTX) & (col < SEQ) & (row == col - N_CTX))).astype(jnp.float32)
    ptok_pre = jnp.dot(tok_f, shift_m, preferred_element_type=jnp.float32)   # (8, 128), exact

    # EOT fixup: if prompt_token[:, -1] != 0 -> token[argmax(token)] == max token id.
    # (max in f32 is exact for token ids < 2^24, i.e. any CLIP-sized vocabulary.)
    maxv = jnp.max(tok_f, axis=1, keepdims=True)                # (8, 1)
    fix = (lane == SEQ - 1) & (ptok_pre != 0.0)
    ptok = jnp.where(fix, maxv, ptok_pre)
    pt_ref[...] = ptok                                          # one aligned (8,128) store

    # ---- prompt embeddings: ONE fused one-hot matmul against [emb_table ; ctx ; 0] ------
    # ctx slots select the appended ctx rows (64 + pos - 1) of the augmented table, so the
    # "prompt_embedding[:, 1:1+n_ctx] = ctx" overwrite is folded into the same matmul.
    idx = jnp.where((lane >= 1) & (lane <= N_CTX),
                    VOCAB - 1 + lane, ptok.astype(jnp.int32))   # (8, 128) int32 row index
    vio = jax.lax.broadcasted_iota(jnp.int32, (VPAD, LANES), 0)  # vocab id on sublanes
    rows = []
    for b in range(bsz):                                        # tiny static batch unroll
        onehot_t = (idx[b:b + 1, :] == vio).astype(jnp.float32)  # (128, 128) [vocab, pos]
        rows.append(jnp.transpose(onehot_t)[:SEQ_PAD, :])        # (80, 128)  [pos, vocab]
    onehot = jnp.concatenate(rows, axis=0)                       # (bsz*80, 128), tile-aligned
    table = table_ref[...]                                       # (128, 512) f32
    pe_ref[...] = jnp.dot(onehot, table,
                          preferred_element_type=jnp.float32)    # one aligned (bsz*80,512) store

    # ---- proj(ctx) + shared compound projection: bf16 operands, f32 accumulate ----------
    # ctx rows are reused straight from the augmented table (rows 64..71; 68..71 are zero,
    # producing bias-only junk rows that the wrapper slices off).
    ctx8 = table[VOCAB:VOCAB + SUBL, :].astype(jnp.bfloat16)     # (8, 512)
    proj8 = jnp.dot(ctx8, pw_ref[...], preferred_element_type=jnp.float32) + pb_ref[...]
    vis = jnp.dot(comp_ref[...], cw_ref[...], preferred_element_type=jnp.float32) + cb_ref[...]
    proj_ref[...] = jnp.concatenate([proj8, vis], axis=0)        # one aligned (16,768) store


# ---------------------------------------------------------------------------
# Module forward (layout plumbing in plain JAX, all compute in the fused kernel).
# ---------------------------------------------------------------------------
def multimodal_prompt_learner_forward(text, params):
    ctx = params["ctx"]
    comp = params["compound_prompts_text"]                      # list of (N_CTX, 512) f32
    n_comp = len(comp)
    bsz, seq = text.shape
    assert seq == SEQ and bsz <= SUBL

    # Tokens: lane-dense, padded to a single (8, 128) int32 tile (4 KiB, one aligned DMA).
    tok = jnp.zeros((SUBL, LANES), jnp.int32).at[:bsz, :SEQ].set(text.astype(jnp.int32))

    # Augmented, tile-padded embedding table (f32: the embedding lookup must stay exact and
    # it is only 256 KiB of DMA): rows [0,64)=emb_table, [64,68)=ctx, [68,128)=0.
    table = jnp.zeros((VPAD, CTX_DIM), jnp.float32)
    table = table.at[:VOCAB, :].set(params["emb_table"])
    table = table.at[VOCAB:VOCAB + N_CTX, :].set(ctx)

    # Projection weights in bf16 (halves the dominant ~3 MiB weight DMA); biases stay f32 and
    # the matmuls accumulate in f32, so the absolute error stays ~1e-5..1e-4.
    comp_rows = n_comp * N_CTX
    comp_pad = max(SUBL, ((comp_rows + SUBL - 1) // SUBL) * SUBL)
    comp_flat = jnp.zeros((comp_pad, CTX_DIM), jnp.bfloat16)
    comp_flat = comp_flat.at[:comp_rows, :].set(
        jnp.stack(list(comp), axis=0).reshape(comp_rows, CTX_DIM).astype(jnp.bfloat16))
    pw = params["proj_w"].T.astype(jnp.bfloat16)                 # (512, 768)
    pb = params["proj_b"].reshape(1, PROJ_DIM)                   # f32
    cw = params["comp_w"].T.astype(jnp.bfloat16)                 # single shared compound weight
    cb = params["comp_b"].reshape(1, PROJ_DIM)

    pe_rows = bsz * SEQ_PAD
    proj_rows = SUBL + comp_pad

    # Advisory cost estimate so XLA can schedule/overlap this tiny custom call (review #9).
    in_bytes = (tok.size * 4 + table.size * 4 + comp_flat.size * 2
                + pw.size * 2 + cw.size * 2 + (pb.size + cb.size) * 4)
    out_bytes = (pe_rows * CTX_DIM + SUBL * LANES + proj_rows * PROJ_DIM) * 4
    flops = 2 * (SUBL * LANES * LANES                    # shift-permutation matmul
                 + pe_rows * VPAD * CTX_DIM              # fused one-hot embedding matmul
                 + (SUBL + comp_pad) * CTX_DIM * PROJ_DIM)  # the two projections
    cost = pl.CostEstimate(flops=flops, transcendentals=0, bytes_accessed=in_bytes + out_bytes)

    pe_all, pt_pad, proj_merged = pl.pallas_call(
        functools.partial(_fused_kernel, bsz=bsz),
        out_shape=(
            jax.ShapeDtypeStruct((pe_rows, CTX_DIM), jnp.float32),
            jax.ShapeDtypeStruct((SUBL, LANES), jnp.float32),
            jax.ShapeDtypeStruct((proj_rows, PROJ_DIM), jnp.float32),
        ),
        cost_estimate=cost,
        # Grid-free: ~2.3 MiB resident VMEM fits every generation's scoped default.
        # TODO(synk): on v7x the ~1.5 MiB of weight DMA could be split across the two
        # TensorCores with grid=(2,) + dimension_semantics=("parallel",); at this size the
        # per-core step overhead likely cancels the win, so it stays single-core.
    )(tok, table, comp_flat, pw, pb, cw, cb)

    pe = pe_all.reshape(bsz, SEQ_PAD, CTX_DIM)[:, :SEQ, :]
    pt = pt_pad[:bsz, :SEQ]
    ctx_proj = proj_merged[:N_CTX, :]
    vis_flat = proj_merged[SUBL:SUBL + comp_rows, :]
    visual_deep_prompts = [vis_flat[i * N_CTX:(i + 1) * N_CTX] for i in range(n_comp)]
    return (pe, pt, ctx, ctx_proj, comp, visual_deep_prompts)


# ---------------------------------------------------------------------------
# Deterministic parameter init (synthetic; mirrors the __init__ shapes).
# ---------------------------------------------------------------------------
def init_params(key):
    ks = jax.random.split(key, 6)
    ctx = 0.02 * jax.random.normal(ks[0], (N_CTX, CTX_DIM), jnp.float32)
    emb_table = 0.02 * jax.random.normal(ks[1], (VOCAB, CTX_DIM), jnp.float32)
    bound = 1.0 / math.sqrt(CTX_DIM)
    proj_w = jax.random.uniform(ks[2], (PROJ_DIM, CTX_DIM), jnp.float32, -bound, bound)
    proj_b = jax.random.uniform(ks[3], (PROJ_DIM,), jnp.float32, -bound, bound)
    compound_prompts_text = [
        0.02 * jax.random.normal(jax.random.fold_in(ks[4], i), (N_CTX, 512), jnp.float32)
        for i in range(DEPTH - 1)
    ]
    # _get_clones deepcopies one Linear, so every compound projection shares the same init.
    comp_w = jax.random.uniform(jax.random.fold_in(ks[5], 0),
                                (PROJ_DIM, CTX_DIM), jnp.float32, -bound, bound)
    comp_b = jax.random.uniform(jax.random.fold_in(ks[5], 1),
                                (PROJ_DIM,), jnp.float32, -bound, bound)
    return dict(ctx=ctx, emb_table=emb_table, proj_w=proj_w, proj_b=proj_b,
                compound_prompts_text=compound_prompts_text,
                comp_w=comp_w, comp_b=comp_b)


# Pure-JAX (full f32) reference for verification.
def ref_forward(text, params):
    tokens = text
    pt = jnp.zeros((tokens.shape[0], SEQ), jnp.float32)
    pt = pt.at[:, 0].set(tokens[:, 0].astype(jnp.float32))
    pt = pt.at[:, N_CTX + 1:].set(tokens[:, 1:1 + TRUNC].astype(jnp.float32))
    max_tok = jnp.max(tokens, axis=1).astype(jnp.float32)
    last = pt[:, -1]
    pt = pt.at[:, -1].set(jnp.where(last != 0, max_tok, last))
    pe = params["emb_table"][pt.astype(jnp.int32)]
    pe = pe.at[:, 1:1 + N_CTX, :].set(params["ctx"])
    ctx_proj = params["ctx"] @ params["proj_w"].T + params["proj_b"]
    visual = [cp @ params["comp_w"].T + params["comp_b"]
              for cp in params["compound_prompts_text"]]
    return pe, pt, ctx_proj, visual


if __name__ == "__main__":
    key = jax.random.PRNGKey(0)
    params = init_params(key)

    # Deterministic synthetic tokenized text: (B, 77) int32, SOT=1, EOT=VOCAB-1, 0 padding.
    tkey = jax.random.fold_in(key, 123)
    body = jax.random.randint(tkey, (B, 10), 2, VOCAB - 1)
    text = jnp.zeros((B, SEQ), jnp.int32)
    text = text.at[:, 0].set(1)
    text = text.at[:, 1:11].set(body)
    text = text.at[:, 11].set(VOCAB - 1)
    # Make the second row "full length" so the prompt_token[-1] != 0 branch is exercised.
    long_body = jax.random.randint(jax.random.fold_in(key, 7), (SEQ - 2,), 2, VOCAB - 2)
    text = text.at[1, 1:SEQ - 1].set(long_body)
    text = text.at[1, SEQ - 1].set(VOCAB - 1)

    fwd = jax.jit(multimodal_prompt_learner_forward)
    outs = fwd(text, params)
    jax.block_until_ready(outs)
    pe, pt, ctx, ctx_proj, comp, visual = outs

    # Verify against the pure-f32 reference.
    pe_r, pt_r, ctx_proj_r, visual_r = ref_forward(text, params)
    np.testing.assert_allclose(np.asarray(pt), np.asarray(pt_r), atol=1e-5, rtol=1e-5)
    np.testing.assert_allclose(np.asarray(pe), np.asarray(pe_r), atol=1e-5, rtol=1e-5)
    # Projections use bf16 weight operands with f32 accumulation (review item #1), so the
    # comparison against the f32 reference uses a bf16-appropriate tolerance.
    np.testing.assert_allclose(np.asarray(ctx_proj), np.asarray(ctx_proj_r), atol=2e-3, rtol=2e-3)
    for v, vr in zip(visual, visual_r):
        np.testing.assert_allclose(np.asarray(v), np.asarray(vr), atol=2e-3, rtol=2e-3)
    assert pe.shape == (B, SEQ, CTX_DIM) and pt.shape == (B, SEQ)
    assert ctx.shape == (N_CTX, CTX_DIM) and ctx_proj.shape == (N_CTX, PROJ_DIM)
    assert len(comp) == DEPTH - 1 and len(visual) == DEPTH - 1

    print("KERNEL_OK")
</pallas_src>

<mosaic_0001>
module attributes {stable_mosaic.version = 11 : i64} {
  func.func @_fused_kernel(%arg0: memref<8x128xi32, #tpu.memory_space<vmem>>, %arg1: memref<128x512xf32, #tpu.memory_space<vmem>>, %arg2: memref<8x512xbf16, #tpu.memory_space<vmem>>, %arg3: memref<512x768xbf16, #tpu.memory_space<vmem>>, %arg4: memref<1x768xf32, #tpu.memory_space<vmem>>, %arg5: memref<512x768xbf16, #tpu.memory_space<vmem>>, %arg6: memref<1x768xf32, #tpu.memory_space<vmem>>, %arg7: memref<160x512xf32, #tpu.memory_space<vmem>>, %arg8: memref<8x128xf32, #tpu.memory_space<vmem>>, %arg9: memref<16x768xf32, #tpu.memory_space<vmem>>) attributes {dimension_semantics = [], scalar_prefetch = 0 : i64, scratch_operands = 0 : i64, tpu.core_type = #tpu.core_type<tc>} {
    %c0 = arith.constant 0 : index
    %c0_0 = arith.constant 0 : index
    %0 = vector.load %arg0[%c0, %c0_0] : memref<8x128xi32, #tpu.memory_space<vmem>>, vector<8x128xi32>
    %1 = arith.sitofp %0 : vector<8x128xi32> to vector<8x128xf32>
    %2 = tpu.iota {dimensions = array<i32: 1>} : vector<8x128xi32>
    %3 = tpu.iota {dimensions = array<i32: 0>} : vector<128x128xi32>
    %4 = tpu.iota {dimensions = array<i32: 1>} : vector<128x128xi32>
    %c0_i32 = arith.constant 0 : i32
    %5 = vector.broadcast %c0_i32 : i32 to vector<128x128xi32>
    %6 = arith.cmpi eq, %4, %5 : vector<128x128xi32>
    %c0_i32_1 = arith.constant 0 : i32
    %7 = vector.broadcast %c0_i32_1 : i32 to vector<128x128xi32>
    %8 = arith.cmpi eq, %3, %7 : vector<128x128xi32>
    %9 = arith.andi %6, %8 : vector<128x128xi1>
    %c4_i32 = arith.constant 4 : i32
    %10 = vector.broadcast %c4_i32 : i32 to vector<128x128xi32>
    %11 = arith.cmpi sgt, %4, %10 : vector<128x128xi32>
    %c77_i32 = arith.constant 77 : i32
    %12 = vector.broadcast %c77_i32 : i32 to vector<128x128xi32>
    %13 = arith.cmpi slt, %4, %12 : vector<128x128xi32>
    %14 = arith.andi %11, %13 : vector<128x128xi1>
    %c4_i32_2 = arith.constant 4 : i32
    %15 = vector.broadcast %c4_i32_2 : i32 to vector<128x128xi32>
    %16 = arith.subi %4, %15 : vector<128x128xi32>
    %17 = arith.cmpi eq, %3, %16 : vector<128x128xi32>
    %18 = arith.andi %14, %17 : vector<128x128xi1>
    %19 = arith.ori %9, %18 : vector<128x128xi1>
    %20 = arith.extui %19 : vector<128x128xi1> to vector<128x128xi32>
    %21 = arith.sitofp %20 : vector<128x128xi32> to vector<128x128xf32>
    %cst = arith.constant dense<0.000000e+00> : vector<8x128xf32>
    %22 = tpu.matmul %1, %21, %cst {dimension_numbers = #tpu.dot_dimension_numbers<[1], [0], [0], [1], [0, 0, 1, 1], [], []>} : vector<8x128xf32>, vector<128x128xf32>, vector<8x128xf32> -> vector<8x128xf32>
    %cst_3 = arith.constant dense<0xFF800000> : vector<8xf32>
    %23 = vector.multi_reduction <maximumf>, %1, %cst_3 [1] : vector<8x128xf32> to vector<8xf32>
    %24 = vector.shape_cast %23 : vector<8xf32> to vector<8x1xf32>
    %c76_i32 = arith.constant 76 : i32
    %25 = vector.broadcast %c76_i32 : i32 to vector<8x128xi32>
    %26 = arith.cmpi eq, %2, %25 : vector<8x128xi32>
    %cst_4 = arith.constant 0.000000e+00 : f32
    %27 = vector.broadcast %cst_4 : f32 to vector<8x128xf32>
    %28 = arith.cmpf one, %22, %27 : vector<8x128xf32>
    %29 = arith.andi %26, %28 : vector<8x128xi1>
    %30 = vector.shape_cast %24 : vector<8x1xf32> to vector<8x1xf32>
    %31 = vector.broadcast %30 : vector<8x1xf32> to vector<8x128xf32>
    %32 = arith.select %29, %31, %22 : vector<8x128xi1>, vector<8x128xf32>
    %c0_5 = arith.constant 0 : index
    %c0_6 = arith.constant 0 : index
    %33 = vector.load %arg8[%c0_5, %c0_6] : memref<8x128xf32, #tpu.memory_space<vmem>>, vector<8x128xf32>
    tpu.vector_store %arg8[%c0_5, %c0_6], %32 {strides = array<i32>} : memref<8x128xf32, #tpu.memory_space<vmem>>, vector<8x128xf32>,
    %c1_i32 = arith.constant 1 : i32
    %34 = vector.broadcast %c1_i32 : i32 to vector<8x128xi32>
    %35 = arith.cmpi sge, %2, %34 : vector<8x128xi32>
    %c4_i32_7 = arith.constant 4 : i32
    %36 = vector.broadcast %c4_i32_7 : i32 to vector<8x128xi32>
    %37 = arith.cmpi sle, %2, %36 : vector<8x128xi32>
    %38 = arith.andi %35, %37 : vector<8x128xi1>
    %c63_i32 = arith.constant 63 : i32
    %39 = vector.broadcast %c63_i32 : i32 to vector<8x128xi32>
    %40 = arith.addi %39, %2 : vector<8x128xi32>
    %41 = arith.fptosi %32 : vector<8x128xf32> to vector<8x128xi32>
    %42 = arith.select %38, %40, %41 : vector<8x128xi1>, vector<8x128xi32>
    %43 = tpu.iota {dimensions = array<i32: 0>} : vector<128x128xi32>
    %44 = vector.extract_strided_slice %42 {offsets = [0, 0], sizes = [1, 128], strides = [1, 1]} : vector<8x128xi32> to vector<1x128xi32>
    %45 = vector.broadcast %44 : vector<1x128xi32> to vector<128x128xi32>
    %46 = arith.cmpi eq, %45, %43 : vector<128x128xi32>
    %47 = arith.extui %46 : vector<128x128xi1> to vector<128x128xi32>
    %48 = arith.sitofp %47 : vector<128x128xi32> to vector<128x128xf32>
    %49 = tpu.transpose %48, [1, 0] : vector<128x128xf32> -> vector<128x128xf32>
    %50 = vector.extract_strided_slice %49 {offsets = [0, 0], sizes = [80, 128], strides = [1, 1]} : vector<128x128xf32> to vector<80x128xf32>
    %51 = vector.extract_strided_slice %42 {offsets = [1, 0], sizes = [1, 128], strides = [1, 1]} : vector<8x128xi32> to vector<1x128xi32>
    %52 = vector.broadcast %51 : vector<1x128xi32> to vector<128x128xi32>
    %53 = arith.cmpi eq, %52, %43 : vector<128x128xi32>
    %54 = arith.extui %53 : vector<128x128xi1> to vector<128x128xi32>
    %55 = arith.sitofp %54 : vector<128x128xi32> to vector<128x128xf32>
    %56 = tpu.transpose %55, [1, 0] : vector<128x128xf32> -> vector<128x128xf32>
    %57 = vector.extract_strided_slice %56 {offsets = [0, 0], sizes = [80, 128], strides = [1, 1]} : vector<128x128xf32> to vector<80x128xf32>
    %58 = tpu.concatenate %50, %57 in 0 : vector<80x128xf32>, vector<80x128xf32> -> vector<160x128xf32>
    %c0_8 = arith.constant 0 : index
    %c0_9 = arith.constant 0 : index
    %59 = vector.load %arg1[%c0_8, %c0_9] : memref<128x512xf32, #tpu.memory_space<vmem>>, vector<128x512xf32>
    %cst_10 = arith.constant dense<0.000000e+00> : vector<160x512xf32>
    %60 = tpu.matmul %58, %59, %cst_10 {dimension_numbers = #tpu.dot_dimension_numbers<[1], [0], [0], [1], [0, 0, 1, 1], [], []>} : vector<160x128xf32>, vector<128x512xf32>, vector<160x512xf32> -> vector<160x512xf32>
    %c0_11 = arith.constant 0 : index
    %c0_12 = arith.constant 0 : index
    %61 = vector.load %arg7[%c0_11, %c0_12] : memref<160x512xf32, #tpu.memory_space<vmem>>, vector<160x512xf32>
    tpu.vector_store %arg7[%c0_11, %c0_12], %60 {strides = array<i32>} : memref<160x512xf32, #tpu.memory_space<vmem>>, vector<160x512xf32>,
    %62 = vector.extract_strided_slice %59 {offsets = [64, 0], sizes = [8, 512], strides = [1, 1]} : vector<128x512xf32> to vector<8x512xf32>
    %63 = arith.truncf %62 : vector<8x512xf32> to vector<8x512xbf16>
    %c0_13 = arith.constant 0 : index
    %c0_14 = arith.constant 0 : index
    %64 = vector.load %arg3[%c0_13, %c0_14] : memref<512x768xbf16, #tpu.memory_space<vmem>>, vector<512x768xbf16>
    %cst_15 = arith.constant dense<0.000000e+00> : vector<8x768xf32>
    %65 = tpu.matmul %63, %64, %cst_15 {dimension_numbers = #tpu.dot_dimension_numbers<[1], [0], [0], [1], [0, 0, 1, 1], [], []>} : vector<8x512xbf16>, vector<512x768xbf16>, vector<8x768xf32> -> vector<8x768xf32>
    %c0_16 = arith.constant 0 : index
    %c0_17 = arith.constant 0 : index
    %66 = vector.load %arg4[%c0_16, %c0_17] : memref<1x768xf32, #tpu.memory_space<vmem>>, vector<1x768xf32>
    %67 = vector.broadcast %66 : vector<1x768xf32> to vector<8x768xf32>
    %68 = arith.addf %65, %67 : vector<8x768xf32>
    %c0_18 = arith.constant 0 : index
    %c0_19 = arith.constant 0 : index
    %69 = vector.load %arg2[%c0_18, %c0_19] : memref<8x512xbf16, #tpu.memory_space<vmem>>, vector<8x512xbf16>
    %c0_20 = arith.constant 0 : index
    %c0_21 = arith.constant 0 : index
    %70 = vector.load %arg5[%c0_20, %c0_21] : memref<512x768xbf16, #tpu.memory_space<vmem>>, vector<512x768xbf16>
    %cst_22 = arith.constant dense<0.000000e+00> : vector<8x768xf32>
    %71 = tpu.matmul %69, %70, %cst_22 {dimension_numbers = #tpu.dot_dimension_numbers<[1], [0], [0], [1], [0, 0, 1, 1], [], []>} : vector<8x512xbf16>, vector<512x768xbf16>, vector<8x768xf32> -> vector<8x768xf32>
    %c0_23 = arith.constant 0 : index
    %c0_24 = arith.constant 0 : index
    %72 = vector.load %arg6[%c0_23, %c0_24] : memref<1x768xf32, #tpu.memory_space<vmem>>, vector<1x768xf32>
    %73 = vector.broadcast %72 : vector<1x768xf32> to vector<8x768xf32>
    %74 = arith.addf %71, %73 : vector<8x768xf32>
    %75 = tpu.concatenate %68, %74 in 0 : vector<8x768xf32>, vector<8x768xf32> -> vector<16x768xf32>
    %c0_25 = arith.constant 0 : index
    %c0_26 = arith.constant 0 : index
    %76 = vector.load %arg9[%c0_25, %c0_26] : memref<16x768xf32, #tpu.memory_space<vmem>>, vector<16x768xf32>
    tpu.vector_store %arg9[%c0_25, %c0_26], %75 {strides = array<i32>} : memref<16x768xf32, #tpu.memory_space<vmem>>, vector<16x768xf32>,
    return
  }
}

</mosaic_0001>

<bundles_post_ra>
// kernel: multimodal_prompt_learner_forward.1
= control target key start
LH: loop header
LB: loop body
LE: loop exit
PB: predicated region body
PF: predicated region fallthrough
CT: control target
= control target key end

     0   :  { %v31_v0 = vlaneseq  ;;  %v4930_v1 = vmov 0.0   ;;  %vm4931_vm0 = vmmov 0   ;;  %v4932_v13 = vmov 1.0   ;;  %s7033_s0 = inlined_call_operand.vmem [shape: s32[8,128], index: 0, kind: input, shape index: {}]   ;;  %s7034_s1 = inlined_call_operand.vmem [shape: f32[128,512], index: 1, kind: input, shape index: {}]   ;;  %s7035_s3 = inlined_call_operand.vmem [shape: bf16[512,768], index: 3, kind: input, shape index: {}]   ;;  %s7036_s8 = inlined_call_operand.vmem [shape: f32[8,128], index: 8, kind: output, shape index: {1}]   ;;  %s7037_s5 = inlined_call_operand.vmem [shape: bf16[512,768], index: 5, kind: input, shape index: {}]   ;;  %s7038_s7 = inlined_call_operand.vmem [shape: f32[160,512], index: 7, kind: output, shape index: {0}]   ;;  %s7039_s2 = inlined_call_operand.vmem [shape: bf16[8,512], index: 2, kind: input, shape index: {}]   ;;  %s7040_s4 = inlined_call_operand.vmem [shape: f32[1,768], index: 4, kind: input, shape index: {}]   ;;  %s7041_s9 = inlined_call_operand.vmem [shape: f32[16,768], index: 9, kind: output, shape index: {2}]   ;;  %s7042_s6 = inlined_call_operand.vmem [shape: f32[1,768], index: 6, kind: input, shape index: {}]  }
   0x1   :  { %4306 = vmatprep.subr.mxu0 %v4930_v1  ;;  %4338 = vmatprep.mubr.msk.f32.mxu0 %vm4931_vm0, %v4930_v1  ;;  %v4988_v2 = vld [vmem:[%s7033_s0] sm:$0xff]  ;;  %v479_v24 = vld [vmem:[%s7034_s1 + $0x1e8] sm:$0xff]  ;;  %v481_v26 = vld [vmem:[%s7034_s1 + $0x1f8] sm:$0xff] }
   0x2   :  { %v4990_v3 = vand.u32 127, %v31_v0  ;;  %v4992_v4 = vshrl.u32 %v31_v0, 7  ;;  %v30_v5 = vcvt.s32.f32 %v4988_v2  ;;  %546 = vmatprep.mubr.f32.mxu1 %v4930_v1  ;;  %v478_v25 = vld [vmem:[%s7034_s1 + $0x1e0] sm:$0xff]  ;;  %482 = vmatprep.subr.mxu1 %v479_v24  ;;  %v475_v27 = vld [vmem:[%s7034_s1 + $0x1c8] sm:$0xff]  ;;  %v480_v28 = vld [vmem:[%s7034_s1 + $0x1f0] sm:$0xff] }
   0x3   :  { %v474_v29 = vld [vmem:[%s7034_s1 + $0x1c0] sm:$0xff]  ;;  %483 = vmatpush1.msra.mxu1 %v478_v25  ;;  %v477_v30 = vld [vmem:[%s7034_s1 + $0x1d8] sm:$0xff]  ;;  %v471_v31 = vld [vmem:[%s7034_s1 + $0x1a8] sm:$0xff] }
   0x4   :  { %v4997_v6 = vadd.s32 120, %v4992_v4  ;;  %vm83_vm1 = vcmp.gt.s32.totalorder %v4990_v3, 4  ;;  %vm84_vm2 = vcmp.lt.s32.totalorder %v4990_v3, 77  ;;  %v5002_v7 = vadd.s32 4294967292, %v4990_v3  ;;  %237 = vmax.xlane.f32.xlu0 %v30_v5  ;;  %v476_v32 = vld [vmem:[%s7034_s1 + $0x1d0] sm:$0xff]  ;;  %484 = vmatprep.subr.mxu1 %v475_v27  ;;  %v470_v33 = vld [vmem:[%s7034_s1 + $0x1a0] sm:$0xff] }
   0x5   :  { %vm5006_vm3 = vmand %vm83_vm1, %vm84_vm2  ;;  %v5011_v9 = vadd.s32 112, %v4992_v4  ;;  %v5014_v10 = vadd.s32 104, %v4992_v4  ;;  %v5017_v11 = vadd.s32 96, %v4992_v4  ;;  %v5022_v12 = vadd.s32 88, %v4992_v4  ;;  %v473_v34 = vld [vmem:[%s7034_s1 + $0x1b8] sm:$0xff]  ;;  %485 = vmatpush1.msra.mxu1 %v474_v29  ;;  %v467_v35 = vld [vmem:[%s7034_s1 + $0x188] sm:$0xff] }
   0x6   :  { %vm102_vm4 = vcmp.eq.s32.totalorder %v4997_v6, %v5002_v7  ;;  %v5036_v14 = vadd.s32 80, %v4992_v4  ;;  %v5045_v15 = vadd.s32 72, %v4992_v4  ;;  %v5054_v16 = vadd.s32 64, %v4992_v4  ;;  %v472_v36 = vld [vmem:[%s7034_s1 + $0x1b0] sm:$0xff]  ;;  %v469_v37 = vld [vmem:[%s7034_s1 + $0x198] sm:$0xff]  ;;  %486 = vmatprep.subr.mxu1 %v471_v31  ;;  %v466_v38 = vld [vmem:[%s7034_s1 + $0x180] sm:$0xff] }
   0x7   :  { %vm118_vm5 = vmand %vm5006_vm3, %vm102_vm4  ;;  %vm101_vm6 = vcmp.eq.s32.totalorder %v5011_v9, %v5002_v7  ;;  %vm100_vm7 = vcmp.eq.s32.totalorder %v5014_v10, %v5002_v7  ;;  %vm99_vm9 = vcmp.eq.s32.totalorder %v5017_v11, %v5002_v7  ;;  %vm98_vm11 = vcmp.eq.s32.totalorder %v5022_v12, %v5002_v7  ;;  %v468_v39 = vld [vmem:[%s7034_s1 + $0x190] sm:$0xff]  ;;  %487 = vmatpush1.msra.mxu1 %v470_v33  ;;  %v463_v40 = vld [vmem:[%s7034_s1 + $0x168] sm:$0xff] }
   0x8   :  { %4307 = vmatpush3.msk.msra.mxu0 %vm118_vm5, %v4932_v13  ;;  %vm117_vm8 = vmand %vm5006_vm3, %vm101_vm6  ;;  %vm97_vm13 = vcmp.eq.s32.totalorder %v5036_v14, %v5002_v7  ;;  %vm96_vm15 = vcmp.eq.s32.totalorder %v5045_v15, %v5002_v7  ;;  %v5063_v17 = vadd.s32 56, %v4992_v4  ;;  %vm95_vm1 = vcmp.eq.s32.totalorder %v5054_v16, %v5002_v7  ;;  %v465_v41 = vld [vmem:[%s7034_s1 + $0x178] sm:$0xff]  ;;  %488 = vmatprep.subr.mxu1 %v467_v35  ;;  %v462_v42 = vld [vmem:[%s7034_s1 + $0x160] sm:$0xff] }
   0x9   :  { %4308 = vmatprep.subr.mxu0 %v4930_v1  ;;  %vm116_vm10 = vmand %vm5006_vm3, %vm100_vm7  ;;  %v5072_v18 = vadd.s32 48, %v4992_v4  ;;  %v5081_v19 = vadd.s32 40, %v4992_v4  ;;  %v5090_v20 = vadd.s32 32, %v4992_v4  ;;  %v5099_v21 = vadd.s32 24, %v4992_v4  ;;  %v464_v43 = vld [vmem:[%s7034_s1 + $0x170] sm:$0xff]  ;;  %489 = vmatpush1.msra.mxu1 %v466_v38  ;;  %v459_v44 = vld [vmem:[%s7034_s1 + $0x148] sm:$0xff] }
   0xa   :  { %4309 = vmatpush3.msk.msra.mxu0 %vm117_vm8, %v4932_v13  ;;  %vm115_vm12 = vmand %vm5006_vm3, %vm99_vm9  ;;  %vm94_vm4 = vcmp.eq.s32.totalorder %v5063_v17, %v5002_v7  ;;  %v5105_v22 = vadd.s32 16, %v4992_v4  ;;  %v5117_v23 = vadd.s32 8, %v4992_v4  ;;  %v461_v45 = vld [vmem:[%s7034_s1 + $0x158] sm:$0xff]  ;;  %490 = vmatprep.subr.mxu1 %v463_v40  ;;  %v458_v46 = vld [vmem:[%s7034_s1 + $0x140] sm:$0xff] }
   0xb   :  { %4310 = vmatprep.subr.mxu0 %v4930_v1  ;;  %vm114_vm14 = vmand %vm5006_vm3, %vm98_vm11  ;;  %vm93_vm6 = vcmp.eq.s32.totalorder %v5072_v18, %v5002_v7  ;;  %vm92_vm8 = vcmp.eq.s32.totalorder %v5081_v19, %v5002_v7  ;;  %v460_v47 = vld [vmem:[%s7034_s1 + $0x150] sm:$0xff]  ;;  %491 = vmatpush1.msra.mxu1 %v462_v42  ;;  %v455_v48 = vld [vmem:[%s7034_s1 + $0x128] sm:$0xff] }
   0xc   :  { %4311 = vmatpush3.msk.msra.mxu0 %vm116_vm10, %v4932_v13  ;;  %vm113_vm0 = vmand %vm5006_vm3, %vm97_vm13  ;;  %vm91_vm10 = vcmp.eq.s32.totalorder %v5090_v20, %v5002_v7  ;;  %v457_v49 = vld [vmem:[%s7034_s1 + $0x138] sm:$0xff]  ;;  %492 = vmatprep.subr.mxu1 %v459_v44  ;;  %v454_v50 = vld [vmem:[%s7034_s1 + $0x120] sm:$0xff] }
   0xd   :  { %4312 = vmatprep.subr.mxu0 %v4930_v1  ;;  %vm112_vm2 = vmand %vm5006_vm3, %vm96_vm15  ;;  %vm50_vm15 = vcmp.eq.s32.totalorder %v4990_v3, 0  ;;  %v456_v51 = vld [vmem:[%s7034_s1 + $0x130] sm:$0xff]  ;;  %493 = vmatpush1.msra.mxu1 %v458_v46  ;;  %v451_v52 = vld [vmem:[%s7034_s1 + $0x108] sm:$0xff] }
   0xe   :  { %4313 = vmatpush3.msk.msra.mxu0 %vm115_vm12, %v4932_v13  ;;  %vm111_vm5 = vmand %vm5006_vm3, %vm95_vm1  ;;  %vm90_vm12 = vcmp.eq.s32.totalorder %v5099_v21, %v5002_v7  ;;  %v453_v53 = vld [vmem:[%s7034_s1 + $0x118] sm:$0xff]  ;;  %494 = vmatprep.subr.mxu1 %v455_v48  ;;  %v450_v54 = vld [vmem:[%s7034_s1 + $0x100] sm:$0xff] }
   0xf   :  { %4314 = vmatprep.subr.mxu0 %v4930_v1  ;;  %vm110_vm7 = vmand %vm5006_vm3, %vm94_vm4  ;;  %v452_v55 = vld [vmem:[%s7034_s1 + $0x110] sm:$0xff]  ;;  %495 = vmatpush1.msra.mxu1 %v454_v50  ;;  %v447_v56 = vld [vmem:[%s7034_s1 + $0xe8] sm:$0xff]  ;;  %v5358_v50 = vsub.s32 1, %v4992_v4 }
  0x10   :  { %4315 = vmatpush3.msk.msra.mxu0 %vm114_vm14, %v4932_v13  ;;  %vm109_vm9 = vmand %vm5006_vm3, %vm93_vm6  ;;  %vm89_vm14 = vcmp.eq.s32.totalorder %v5105_v22, %v5002_v7  ;;  %v449_v57 = vld [vmem:[%s7034_s1 + $0xf8] sm:$0xff]  ;;  %496 = vmatprep.subr.mxu1 %v451_v52  ;;  %v446_v58 = vld [vmem:[%s7034_s1 + $0xe0] sm:$0xff] }
  0x11   :  { %4316 = vmatprep.subr.mxu0 %v4930_v1  ;;  %vm108_vm11 = vmand %vm5006_vm3, %vm92_vm8  ;;  %v448_v59 = vld [vmem:[%s7034_s1 + $0xf0] sm:$0xff]  ;;  %497 = vmatpush1.msra.mxu1 %v450_v54  ;;  %v443_v60 = vld [vmem:[%s7034_s1 + $0xc8] sm:$0xff] }
  0x12   :  { %4317 = vmatpush3.msk.msra.mxu0 %vm113_vm0, %v4932_v13  ;;  %vm107_vm13 = vmand %vm5006_vm3, %vm91_vm10  ;;  %vm51_vm0 = vcmp.eq.s32.totalorder %v4992_v4, 0  ;;  %v445_v61 = vld [vmem:[%s7034_s1 + $0xd8] sm:$0xff]  ;;  %498 = vmatprep.subr.mxu1 %v447_v56  ;;  %v442_v62 = vld [vmem:[%s7034_s1 + $0xc0] sm:$0xff]  ;;  %vm245_vm10 = vcmp.le.s32.totalorder %v4990_v3, 4 }
  0x13   :  { %4318 = vmatprep.subr.mxu0 %v4930_v1  ;;  %vm106_vm1 = vmand %vm5006_vm3, %vm90_vm12  ;;  %v444_v63 = vld [vmem:[%s7034_s1 + $0xd0] sm:$0xff]  ;;  %499 = vmatpush1.msra.mxu1 %v446_v58  ;;  %v439_v0 = vld [vmem:[%s7034_s1 + $0xa8] sm:$0xff]  ;;  %vm239_vm12 = vcmp.eq.s32.totalorder %v4990_v3, 76 }
  0x14   :  { %4319 = vmatpush3.msk.msra.mxu0 %vm112_vm2, %v4932_v13  ;;  %vm87_vm2 = vcmp.eq.s32.totalorder %v4992_v4, %v5002_v7  ;;  %vm105_vm4 = vmand %vm5006_vm3, %vm89_vm14  ;;  %v438_v2 = vld [vmem:[%s7034_s1 + $0xa0] sm:$0xff]  ;;  %500 = vmatprep.subr.mxu1 %v443_v60  ;;  %v440_v8 = vld [vmem:[%s7034_s1 + $0xb0] sm:$0xff] }
  0x15   :  { %4320 = vmatprep.subr.mxu0 %v4930_v1  ;;  %vm67_vm6 = vmand %vm50_vm15, %vm51_vm0  ;;  %501 = vmatpush1.msra.mxu1 %v442_v62  ;;  %v437_v24 = vld [vmem:[%s7034_s1 + $0x98] sm:$0xff]  ;;  %v431_v25 = vld [vmem:[%s7034_s1 + $0x68] sm:$0xff] }
  0x16   :  { %4321 = vmatpush3.msk.msra.mxu0 %vm111_vm5, %v4932_v13  ;;  %vm88_vm5 = vcmp.eq.s32.totalorder %v5117_v23, %v5002_v7  ;;  %v435_v7 = vld [vmem:[%s7034_s1 + $0x88] sm:$0xff]  ;;  %502 = vmatprep.subr.mxu1 %v439_v0  ;;  %v430_v27 = vld [vmem:[%s7034_s1 + $0x60] sm:$0xff]  ;;  %v429_v31 = vld [vmem:[%s7034_s1 + $0x58] sm:$0xff] }
  0x17   :  { %4322 = vmatprep.subr.mxu0 %v4930_v1  ;;  %vm104_vm8 = vmand %vm5006_vm3, %vm88_vm5  ;;  %503 = vmatpush1.msra.mxu1 %v438_v2  ;;  %v427_v29 = vld [vmem:[%s7034_s1 + $0x48] sm:$0xff]  ;;  %v428_v33 = vld [vmem:[%s7034_s1 + $0x50] sm:$0xff] }
  0x18   :  { %4323 = vmatpush3.msk.msra.mxu0 %vm110_vm7, %v4932_v13  ;;  %vm103_vm7 = vmand %vm5006_vm3, %vm87_vm2  ;;  %504 = vmatprep.subr.mxu1 %v435_v7  ;;  %v425_v35 = vld [vmem:[%s7034_s1 + $0x38] sm:$0xff]  ;;  %v419_v38 = vld [vmem:[%s7034_s1 + $0x8] sm:$0xff]  ;;  %vm244_vm3 = vcmp.ge.s32.totalorder %v4990_v3, 1 }
  0x19   :  { %4324 = vmatprep.subr.mxu0 %v4930_v1  ;;  %v418_v40 = vld [vmem:[%s7034_s1] sm:$0xff]  ;;  %v4348_v42 = vld [vmem:[%s7035_s3 + $0x154] ss:$24 sps:$4 sm:$0xff]  }
  0x1a   :  { %4325 = vmatpush3.msk.msra.mxu0 %vm109_vm9, %v4932_v13  ;;  %vm119_vm9 = vmor %vm67_vm6, %vm103_vm7 }
  0x1b   :  { %4326 = vmatprep.subr.mxu0 %v4930_v1 }
  0x1c   :  { %4327 = vmatpush3.msk.msra.mxu0 %vm108_vm11, %v4932_v13  ;;  %vm246_vm11 = vmand %vm244_vm3, %vm245_vm10 }
  0x1d   :  { %4328 = vmatprep.subr.mxu0 %v4930_v1 }
  0x1e   :  { %4329 = vmatpush3.msk.msra.mxu0 %vm107_vm13, %v4932_v13 }
  0x1f   :  { %4330 = vmatprep.subr.mxu0 %v4930_v1 }
  0x20   :  { %4331 = vmatpush3.msk.msra.mxu0 %vm106_vm1, %v4932_v13 }
  0x21   :  { %4332 = vmatprep.subr.mxu0 %v4930_v1 }
  0x22   :  { %4333 = vmatpush3.msk.msra.mxu0 %vm105_vm4, %v4932_v13 }
  0x23   :  { %4334 = vmatprep.subr.mxu0 %v4930_v1 }
  0x24   :  { %4335 = vmatpush3.msk.msra.mxu0 %vm104_vm8, %v4932_v13 }
  0x25   :  { %4336 = vmatprep.subr.mxu0 %v4930_v1 }
  0x26   :  { %4337 = vmatpush3.msk.msra.mxu0 %vm119_vm9, %v4932_v13  ;;  %v434_v13 = vld [vmem:[%s7034_s1 + $0x80] sm:$0xff] }
  0x27   :  { %4339 = vmatmul.mubr.f32.vlgmr.msra.gmra.mxu0 %v30_v5  ;;  %667 = vmatprep.subr.mxu0 %v481_v26  ;;  %v441_v5 = vld [vmem:[%s7034_s1 + $0xb8] sm:$0xff]  ;;  %v436_v26 = vld [vmem:[%s7034_s1 + $0x90] sm:$0xff] }
  0x28   :  { %731 = vmatprep.mubr.f32.mxu0 %v4930_v1  ;;  %668 = vmatpush1.msra.mxu0 %v480_v28  ;;  %v433_v28 = vld [vmem:[%s7034_s1 + $0x78] sm:$0xff] }
  0x29   :  { %669 = vmatprep.subr.mxu0 %v477_v30  ;;  %v432_v30 = vld [vmem:[%s7034_s1 + $0x70] sm:$0xff]  ;;  %505 = vmatpush1.msra.mxu1 %v434_v13 }
  0x2a   :  { %670 = vmatpush1.msra.mxu0 %v476_v32  ;;  %v426_v32 = vld [vmem:[%s7034_s1 + $0x40] sm:$0xff]  ;;  %506 = vmatprep.subr.mxu1 %v431_v25 }
  0x2b   :  { %671 = vmatprep.subr.mxu0 %v473_v34  ;;  %v423_v34 = vld [vmem:[%s7034_s1 + $0x28] sm:$0xff]  ;;  %507 = vmatpush1.msra.mxu1 %v430_v27 }
  0x2c   :  { %672 = vmatpush1.msra.mxu0 %v472_v36  ;;  %v422_v36 = vld [vmem:[%s7034_s1 + $0x20] sm:$0xff]  ;;  %508 = vmatprep.subr.mxu1 %v427_v29 }
  0x2d   :  { %673 = vmatprep.subr.mxu0 %v469_v37  ;;  %v424_v37 = vld [vmem:[%s7034_s1 + $0x30] sm:$0xff]  ;;  %509 = vmatpush1.msra.mxu1 %v426_v32  ;;  %v4355_v32 = vld [vmem:[%s7035_s3 + $0x420] ss:$24 sps:$4 sm:$0xff]  }
  0x2e   :  { %674 = vmatpush1.msra.mxu0 %v468_v39  ;;  %v421_v39 = vld [vmem:[%s7034_s1 + $0x18] sm:$0xff]  ;;  %510 = vmatprep.subr.mxu1 %v423_v34  ;;  %v4360_v34 = vld [vmem:[%s7035_s3 + $0xf4] ss:$24 sps:$4 sm:$0xff]  }
  0x2f   :  { %675 = vmatprep.subr.mxu0 %v465_v41  ;;  %v420_v41 = vld [vmem:[%s7034_s1 + $0x10] sm:$0xff]  ;;  %511 = vmatpush1.msra.mxu1 %v422_v36 }
  0x30   :  { %676 = vmatpush1.msra.mxu0 %v464_v43  ;;  %512 = vmatprep.subr.mxu1 %v419_v38  ;;  %v4358_v36 = vld [vmem:[%s7035_s3 + $0xf0] ss:$24 sps:$4 sm:$0xff]  }
  0x31   :  { %677 = vmatprep.subr.mxu0 %v461_v45  ;;  %513 = vmatpush1.msra.mxu1 %v418_v40  ;;  %v4369_v40 = vld [vmem:[%s7035_s3 + $0x3c4] ss:$24 sps:$4 sm:$0xff]  }
  0x32   :  { %678 = vmatpush1.msra.mxu0 %v460_v47  ;;  %2120 = vmatprep.subr.bf16.mxu1 %v4348_v42  ;;  %v247_v47 = vadd.s32 63, %v4990_v3  ;;  %v4351_v3 = vld [vmem:[%s7035_s3 + $0x454] ss:$24 sps:$4 sm:$0xff]   ;;  %v4367_v42 = vld [vmem:[%s7035_s3 + $0x3c0] ss:$24 sps:$4 sm:$0xff]  }
  0x33   :  { %679 = vmatprep.subr.mxu0 %v457_v49  ;;  %v5355_v49 = vsub.s32 0, %v4992_v4 }
  0x34   :  { %680 = vmatpush1.msra.mxu0 %v456_v51 }
  0x35   :  { %681 = vmatprep.subr.mxu0 %v453_v53 }
  0x36   :  { %682 = vmatpush1.msra.mxu0 %v452_v55 }
  0x37   :  { %683 = vmatprep.subr.mxu0 %v449_v57 }
  0x38   :  { %684 = vmatpush1.msra.mxu0 %v448_v59 }
  0x39   :  { %685 = vmatprep.subr.mxu0 %v445_v61 }
  0x3a   :  { %686 = vmatpush1.msra.mxu0 %v444_v63 }
  0x3b   :  { %687 = vmatprep.subr.mxu0 %v441_v5 }
  0x3c   :  { %688 = vmatpush1.msra.mxu0 %v440_v8 }
  0x3d   :  { %689 = vmatprep.subr.mxu0 %v437_v24 }
  0x3e   :  { %690 = vmatpush1.msra.mxu0 %v436_v26 }
  0x3f   :  { %691 = vmatprep.subr.mxu0 %v433_v28  ;;  %v4349_v28 = vld [vmem:[%s7035_s3 + $0x450] ss:$24 sps:$4 sm:$0xff]  }
  0x40   :  { %692 = vmatpush1.msra.mxu0 %v432_v30  ;;  %v4354_v30 = vld [vmem:[%s7035_s3 + $0x124] ss:$24 sps:$4 sm:$0xff]  }
  0x41   :  { %693 = vmatprep.subr.mxu0 %v429_v31  ;;  %v4352_v31 = vld [vmem:[%s7035_s3 + $0x120] ss:$24 sps:$4 sm:$0xff]  }
  0x42   :  { %694 = vmatpush1.msra.mxu0 %v428_v33 }
  0x43   :  { %695 = vmatprep.subr.mxu0 %v425_v35  ;;  %v4363_v35 = vld [vmem:[%s7035_s3 + $0x3f4] ss:$24 sps:$4 sm:$0xff]  }
  0x44   :  { %696 = vmatpush1.msra.mxu0 %v424_v37  ;;  %v4361_v37 = vld [vmem:[%s7035_s3 + $0x3f0] ss:$24 sps:$4 sm:$0xff]  }
  0x45   :  { %697 = vmatprep.subr.mxu0 %v421_v39  ;;  %v4366_v39 = vld [vmem:[%s7035_s3 + $0xc4] ss:$24 sps:$4 sm:$0xff]  }
  0x46   :  { %698 = vmatpush1.msra.mxu0 %v420_v41  ;;  %v4364_v41 = vld [vmem:[%s7035_s3 + $0xc0] ss:$24 sps:$4 sm:$0xff]  }
  0x47   :  { %2161 = vmatprep.subr.bf16.mxu0 %v4351_v3 }
  0x8d   :  { %v238_v44 = vpop.xlane.xlu0 %237 }
  0xe7   :  { %v233_v43 = vpop.f32.mrf.mxu0 }
  0xe8   :  { %vm240_vm13 = vcmp.ne.f32.partialorder %v233_v43, 0.0 }
  0xe9   :  { %vm241_vm14 = vmand %vm239_vm12, %vm240_vm13  ;;  %v4340_v45 = vpop.f32.mrf.mxu0 }
  0xea   :  { %v242_v46 = vsel %vm241_vm14, %v238_v44, %v233_v43  ;;  %v4372_v44 = vld [vmem:[%s7035_s3 + $0x94] ss:$24 sps:$4 sm:$0xff]  }
  0xeb   :  { %243 = vst [vmem:[%s7036_s8] sm:$0xff] %v242_v46  ;;  %v4341_v48 = vtrunc.f32 %v242_v46  ;;  %v4375_v45 = vld [vmem:[%s7035_s3 + $0x394] ss:$24 sps:$4 sm:$0xff]   ;;  %v4370_v46 = vld [vmem:[%s7035_s3 + $0x90] ss:$24 sps:$4 sm:$0xff]  }
  0xed   :  { %v4342_v51 = vcvt.f32.s32 %v4341_v48 }
  0xef   :  { %v249_v52 = vsel %vm246_vm11, %v247_v47, %v4342_v51  ;;  %v4373_v47 = vld [vmem:[%s7035_s3 + $0x390] ss:$24 sps:$4 sm:$0xff]   ;;  %v4378_v51 = vld [vmem:[%s7035_s3 + $0x64] ss:$24 sps:$4 sm:$0xff]  }
  0xf0   :  { %v5361_v53 = vrot.slane %v249_v52, %v5355_v49  ;;  %v5364_v54 = vrot.slane %v249_v52, %v5358_v50  ;;  %v4381_v52 = vld [vmem:[%s7035_s3 + $0x364] ss:$24 sps:$4 sm:$0xff]  }
  0xf2   :  { %vm338_vm15 = vcmp.eq.s32.totalorder %v5364_v54, %v4992_v4  ;;  %vm254_vm0 = vcmp.eq.s32.totalorder %v5361_v53, %v4992_v4  ;;  %vm339_vm1 = vcmp.eq.s32.totalorder %v5364_v54, %v5117_v23  ;;  %vm255_vm2 = vcmp.eq.s32.totalorder %v5361_v53, %v5117_v23 }
  0xf3   :  { %v3885_v55 = vsel %vm338_vm15, 1.0, %v4930_v1  ;;  %v3869_v56 = vsel %vm254_vm0, 1.0, %v4930_v1  ;;  %v3886_v57 = vsel %vm339_vm1, 1.0, %v4930_v1  ;;  %v3870_v58 = vsel %vm255_vm2, 1.0, %v4930_v1 }
  0xf4   :  { %386 = vxpose.xlu1.b32.start [1/16] (narrow) %v3885_v55, 80  ;;  %302 = vxpose.xlu0.b32.start [1/16] (narrow) %v3869_v56, 80  ;;  %vm340_vm4 = vcmp.eq.s32.totalorder %v5364_v54, %v5105_v22  ;;  %vm256_vm5 = vcmp.eq.s32.totalorder %v5361_v53, %v5105_v22  ;;  %vm341_vm6 = vcmp.eq.s32.totalorder %v5364_v54, %v5099_v21  ;;  %v4384_v55 = vld [vmem:[%s7035_s3 + $0x34] ss:$24 sps:$4 sm:$0xff]  }
  0xf5   :  { %v3887_v59 = vsel %vm340_vm4, 1.0, %v4930_v1  ;;  %v3871_v60 = vsel %vm256_vm5, 1.0, %v4930_v1  ;;  %vm257_vm7 = vcmp.eq.s32.totalorder %v5361_v53, %v5099_v21  ;;  %v3888_v23 = vsel %vm341_vm6, 1.0, %v4930_v1  ;;  %v4387_v56 = vld [vmem:[%s7035_s3 + $0x334] ss:$24 sps:$4 sm:$0xff]  }
  0xf6   :  { %v3872_v61 = vsel %vm257_vm7, 1.0, %v4930_v1  ;;  %vm342_vm8 = vcmp.eq.s32.totalorder %v5364_v54, %v5090_v20  ;;  %vm258_vm9 = vcmp.eq.s32.totalorder %v5361_v53, %v5090_v20  ;;  %vm343_vm3 = vcmp.eq.s32.totalorder %v5364_v54, %v5081_v19 }
  0xf7   :  { %v3889_v22 = vsel %vm342_vm8, 1.0, %v4930_v1  ;;  %v3873_v62 = vsel %vm258_vm9, 1.0, %v4930_v1  ;;  %vm259_vm10 = vcmp.eq.s32.totalorder %v5361_v53, %v5081_v19  ;;  %v3890_v21 = vsel %vm343_vm3, 1.0, %v4930_v1 }
  0xf8   :  { %387 = vxpose.xlu1.b32.cont [2/16] (narrow) %v3886_v57, 80  ;;  %303 = vxpose.xlu0.b32.cont [2/16] (narrow) %v3870_v58, 80  ;;  %v3874_v63 = vsel %vm259_vm10, 1.0, %v4930_v1  ;;  %vm344_vm11 = vcmp.eq.s32.totalorder %v5364_v54, %v5072_v18  ;;  %vm260_vm12 = vcmp.eq.s32.totalorder %v5361_v53, %v5072_v18  ;;  %vm345_vm13 = vcmp.eq.s32.totalorder %v5364_v54, %v5063_v17  ;;  %v4382_v58 = vld [vmem:[%s7035_s3 + $0x30] ss:$24 sps:$4 sm:$0xff]  }
  0xf9   :  { %v3891_v20 = vsel %vm344_vm11, 1.0, %v4930_v1  ;;  %v3875_v0 = vsel %vm260_vm12, 1.0, %v4930_v1  ;;  %vm261_vm14 = vcmp.eq.s32.totalorder %v5361_v53, %v5063_v17  ;;  %v3892_v19 = vsel %vm345_vm13, 1.0, %v4930_v1 }
  0xfa   :  { %v3876_v2 = vsel %vm261_vm14, 1.0, %v4930_v1  ;;  %vm346_vm15 = vcmp.eq.s32.totalorder %v5364_v54, %v5054_v16  ;;  %vm262_vm0 = vcmp.eq.s32.totalorder %v5361_v53, %v5054_v16  ;;  %vm347_vm1 = vcmp.eq.s32.totalorder %v5364_v54, %v5045_v15 }
  0xfb   :  { %v3893_v18 = vsel %vm346_vm15, 1.0, %v4930_v1  ;;  %v3877_v5 = vsel %vm262_vm0, 1.0, %v4930_v1  ;;  %vm263_vm2 = vcmp.eq.s32.totalorder %v5361_v53, %v5045_v15  ;;  %v3894_v17 = vsel %vm347_vm1, 1.0, %v4930_v1 }
  0xfc   :  { %388 = vxpose.xlu1.b32.cont [3/16] (narrow) %v3887_v59, 80  ;;  %304 = vxpose.xlu0.b32.cont [3/16] (narrow) %v3871_v60, 80  ;;  %v3878_v7 = vsel %vm263_vm2, 1.0, %v4930_v1  ;;  %vm348_vm4 = vcmp.eq.s32.totalorder %v5364_v54, %v5036_v14  ;;  %vm264_vm5 = vcmp.eq.s32.totalorder %v5361_v53, %v5036_v14  ;;  %vm349_vm6 = vcmp.eq.s32.totalorder %v5364_v54, %v5022_v12  ;;  %v4385_v59 = vld [vmem:[%s7035_s3 + $0x330] ss:$24 sps:$4 sm:$0xff]  }
  0xfd   :  { %v3895_v16 = vsel %vm348_vm4, 1.0, %v4930_v1  ;;  %v3879_v8 = vsel %vm264_vm5, 1.0, %v4930_v1  ;;  %vm265_vm7 = vcmp.eq.s32.totalorder %v5361_v53, %v5022_v12  ;;  %v3896_v15 = vsel %vm349_vm6, 1.0, %v4930_v1 }
  0xfe   :  { %v3880_v13 = vsel %vm265_vm7, 1.0, %v4930_v1  ;;  %vm350_vm8 = vcmp.eq.s32.totalorder %v5364_v54, %v5017_v11  ;;  %vm266_vm9 = vcmp.eq.s32.totalorder %v5361_v53, %v5017_v11  ;;  %vm351_vm3 = vcmp.eq.s32.totalorder %v5364_v54, %v5014_v10 }
  0xff   :  { %v3897_v14 = vsel %vm350_vm8, 1.0, %v4930_v1  ;;  %v3881_v24 = vsel %vm266_vm9, 1.0, %v4930_v1  ;;  %vm267_vm10 = vcmp.eq.s32.totalorder %v5361_v53, %v5014_v10  ;;  %v3898_v12 = vsel %vm351_vm3, 1.0, %v4930_v1 }
 0x100   :  { %389 = vxpose.xlu1.b32.cont [4/16] (narrow) %v3888_v23, 80  ;;  %305 = vxpose.xlu0.b32.cont [4/16] (narrow) %v3872_v61, 80  ;;  %v3882_v25 = vsel %vm267_vm10, 1.0, %v4930_v1  ;;  %vm352_vm11 = vcmp.eq.s32.totalorder %v5364_v54, %v5011_v9  ;;  %vm268_vm12 = vcmp.eq.s32.totalorder %v5361_v53, %v5011_v9  ;;  %vm353_vm13 = vcmp.eq.s32.totalorder %v5364_v54, %v4997_v6  ;;  %v4346_v9 = vld [vmem:[%s7035_s3 + $0x150] ss:$24 sps:$4 sm:$0xff]  }
 0x101   :  { %v3899_v11 = vsel %vm352_vm11, 1.0, %v4930_v1  ;;  %v3883_v26 = vsel %vm268_vm12, 1.0, %v4930_v1  ;;  %vm269_vm14 = vcmp.eq.s32.totalorder %v5361_v53, %v4997_v6  ;;  %v3900_v10 = vsel %vm353_vm13, 1.0, %v4930_v1  ;;  %v4357_v6 = vld [vmem:[%s7035_s3 + $0x424] ss:$24 sps:$4 sm:$0xff]  }
 0x102   :  { %v3884_v27 = vsel %vm269_vm14, 1.0, %v4930_v1  ;;  %v4376_v53 = vld [vmem:[%s7035_s3 + $0x60] ss:$24 sps:$4 sm:$0xff]   ;;  %v4390_v23 = vld [vmem:[%s7035_s3 + $0x4] ss:$24 sps:$4 sm:$0xff]  }
 0x103   :  { %v4379_v54 = vld [vmem:[%s7035_s3 + $0x360] ss:$24 sps:$4 sm:$0xff]   ;;  %v4393_v61 = vld [vmem:[%s7035_s3 + $0x304] ss:$24 sps:$4 sm:$0xff]  }
 0x104   :  { %390 = vxpose.xlu1.b32.cont [5/16] (narrow) %v3889_v22, 80  ;;  %306 = vxpose.xlu0.b32.cont [5/16] (narrow) %v3873_v62, 80  ;;  %v4388_v62 = vld [vmem:[%s7035_s3] ss:$24 sps:$4 sm:$0xff]  }
 0x108   :  { %391 = vxpose.xlu1.b32.cont [6/16] (narrow) %v3890_v21, 80  ;;  %307 = vxpose.xlu0.b32.cont [6/16] (narrow) %v3874_v63, 80  ;;  %v4391_v21 = vld [vmem:[%s7035_s3 + $0x300] ss:$24 sps:$4 sm:$0xff]  }
 0x10c   :  { %392 = vxpose.xlu1.b32.cont [7/16] (narrow) %v3891_v20, 80  ;;  %308 = vxpose.xlu0.b32.cont [7/16] (narrow) %v3875_v0, 80  ;;  %v4396_v20 = vld [vmem:[%s7035_s3 + $0x2d4] ss:$24 sps:$4 sm:$0xff]  }
 0x10d   :  { %v4399_v0 = vld [vmem:[%s7035_s3 + $0x5d4] ss:$24 sps:$4 sm:$0xff]  }
 0x110   :  { %393 = vxpose.xlu1.b32.cont [8/16] (narrow) %v3892_v19, 80  ;;  %309 = vxpose.xlu0.b32.cont [8/16] (narrow) %v3876_v2, 80  ;;  %v4394_v19 = vld [vmem:[%s7035_s3 + $0x2d0] ss:$24 sps:$4 sm:$0xff]  }
 0x111   :  { %v4397_v2 = vld [vmem:[%s7035_s3 + $0x5d0] ss:$24 sps:$4 sm:$0xff]  }
 0x114   :  { %394 = vxpose.xlu1.b32.cont [9/16] (narrow) %v3893_v18, 80  ;;  %310 = vxpose.xlu0.b32.cont [9/16] (narrow) %v3877_v5, 80  ;;  %v4402_v5 = vld [vmem:[%s7035_s3 + $0x2a4] ss:$24 sps:$4 sm:$0xff]  }
 0x118   :  { %395 = vxpose.xlu1.b32.cont [10/16] (narrow) %v3894_v17, 80  ;;  %311 = vxpose.xlu0.b32.cont [10/16] (narrow) %v3878_v7, 80  ;;  %v4405_v17 = vld [vmem:[%s7035_s3 + $0x5a4] ss:$24 sps:$4 sm:$0xff]  }
 0x11c   :  { %396 = vxpose.xlu1.b32.cont [11/16] (narrow) %v3895_v16, 80  ;;  %312 = vxpose.xlu0.b32.cont [11/16] (narrow) %v3879_v8, 80  ;;  %v4400_v16 = vld [vmem:[%s7035_s3 + $0x2a0] ss:$24 sps:$4 sm:$0xff]  }
 0x11d   :  { %v4403_v8 = vld [vmem:[%s7035_s3 + $0x5a0] ss:$24 sps:$4 sm:$0xff]  }
 0x120   :  { %397 = vxpose.xlu1.b32.cont [12/16] (narrow) %v3896_v15, 80  ;;  %313 = vxpose.xlu0.b32.cont [12/16] (narrow) %v3880_v13, 80  ;;  %v4408_v13 = vld [vmem:[%s7035_s3 + $0x274] ss:$24 sps:$4 sm:$0xff]  }
 0x124   :  { %398 = vxpose.xlu1.b32.cont [13/16] (narrow) %v3897_v14, 80  ;;  %314 = vxpose.xlu0.b32.cont [13/16] (narrow) %v3881_v24, 80  ;;  %v4411_v14 = vld [vmem:[%s7035_s3 + $0x574] ss:$24 sps:$4 sm:$0xff]  }
 0x128   :  { %399 = vxpose.xlu1.b32.cont [14/16] (narrow) %v3898_v12, 80  ;;  %315 = vxpose.xlu0.b32.cont [14/16] (narrow) %v3882_v25, 80  ;;  %v4406_v12 = vld [vmem:[%s7035_s3 + $0x270] ss:$24 sps:$4 sm:$0xff]  }
 0x129   :  { %v4409_v25 = vld [vmem:[%s7035_s3 + $0x570] ss:$24 sps:$4 sm:$0xff]  }
 0x12c   :  { %400 = vxpose.xlu1.b32.cont [15/16] (narrow) %v3899_v11, 80  ;;  %316 = vxpose.xlu0.b32.cont [15/16] (narrow) %v3883_v26, 80  ;;  %v4414_v11 = vld [vmem:[%s7035_s3 + $0x244] ss:$24 sps:$4 sm:$0xff]  }
 0x12d   :  { %v4417_v26 = vld [vmem:[%s7035_s3 + $0x544] ss:$24 sps:$4 sm:$0xff]  }
 0x130   :  { %401 = vxpose.xlu1.b32.end [16/16] (narrow) %v3900_v10, 80  ;;  %317 = vxpose.xlu0.b32.end [16/16] (narrow) %v3884_v27, 80  ;;  %v4412_v10 = vld [vmem:[%s7035_s3 + $0x240] ss:$24 sps:$4 sm:$0xff]  }
 0x131   :  { %v4415_v27 = vld [vmem:[%s7035_s3 + $0x540] ss:$24 sps:$4 sm:$0xff]  }
 0x170   :  { %v318_v29 = vpop.trf.xlu0  ;;  %v5547_v57 = vpop.trf.xlu1 }
 0x171   :  { %547 = vmatmul.mubr.f32.vlgmr.msra.gmra.mxu1 %v318_v29  ;;  %732 = vmatmul.mubr.f32.vlgmr.msra.gmra.mxu0 %v318_v29  ;;  %v4423_v29 = vld [vmem:[%s7035_s3 + $0x514] ss:$24 sps:$4 sm:$0xff]  }
 0x172   :  { %2121 = vmatpush1.bf16.msra.mxu1 %v4346_v9  ;;  %2162 = vmatpush1.bf16.msra.mxu0 %v4349_v28  ;;  %v4420_v28 = vld [vmem:[%s7035_s3 + $0x214] ss:$24 sps:$4 sm:$0xff]  }
 0x173   :  { %552 = vmatprep.mubr.f32.mxu1 %v4930_v1  ;;  %737 = vmatprep.mubr.f32.mxu0 %v4930_v1 }
 0x174   :  { %v319_v33 = vpop.trf.xlu0  ;;  %2122 = vmatprep.subr.bf16.mxu1 %v4354_v30  ;;  %2163 = vmatprep.subr.bf16.mxu0 %v4357_v6  ;;  %v5565_v22 = vpop.trf.xlu1  ;;  %v4418_v30 = vld [vmem:[%s7035_s3 + $0x210] ss:$24 sps:$4 sm:$0xff]  }
 0x175   :  { %553 = vmatmul.mubr.f32.gmra.mxu1 %v319_v33  ;;  %738 = vmatmul.mubr.f32.gmra.mxu0 %v319_v33  ;;  %v4421_v6 = vld [vmem:[%s7035_s3 + $0x510] ss:$24 sps:$4 sm:$0xff]  }
 0x176   :  { %2123 = vmatpush1.bf16.msra.mxu1 %v4352_v31  ;;  %2164 = vmatpush1.bf16.msra.mxu0 %v4355_v32  ;;  %v4426_v31 = vld [vmem:[%s7035_s3 + $0x1e4] ss:$24 sps:$4 sm:$0xff]  }
 0x177   :  { %558 = vmatprep.mubr.f32.mxu1 %v4930_v1  ;;  %743 = vmatprep.mubr.f32.mxu0 %v4930_v1  ;;  %v4429_v32 = vld [vmem:[%s7035_s3 + $0x4e4] ss:$24 sps:$4 sm:$0xff]  }
 0x178   :  { %v320_v38 = vpop.trf.xlu0  ;;  %2124 = vmatprep.subr.bf16.mxu1 %v4360_v34  ;;  %2165 = vmatprep.subr.bf16.mxu0 %v4363_v35  ;;  %v404_v7 = vpop.trf.xlu1  ;;  %v4424_v34 = vld [vmem:[%s7035_s3 + $0x1e0] ss:$24 sps:$4 sm:$0xff]  }
 0x179   :  { %559 = vmatmul.mubr.f32.gmra.mxu1 %v320_v38  ;;  %744 = vmatmul.mubr.f32.gmra.mxu0 %v320_v38  ;;  %v4427_v35 = vld [vmem:[%s7035_s3 + $0x4e0] ss:$24 sps:$4 sm:$0xff]   ;;  %v4430_v38 = vld [vmem:[%s7035_s3 + $0x1b0] ss:$24 sps:$4 sm:$0xff]  }
 0x17a   :  { %2125 = vmatpush1.bf16.msra.mxu1 %v4358_v36  ;;  %564 = vmatprep.mubr.f32.mxu1 %v4930_v1  ;;  %v4432_v36 = vld [vmem:[%s7035_s3 + $0x1b4] ss:$24 sps:$4 sm:$0xff]  }
 0x17b   :  { %749 = vmatprep.mubr.f32.mxu0 %v4930_v1  ;;  %2166 = vmatpush1.bf16.msra.mxu0 %v4361_v37  ;;  %v4435_v37 = vld [vmem:[%s7035_s3 + $0x4b4] ss:$24 sps:$4 sm:$0xff]  }
 0x17c   :  { %v321_v43 = vpop.trf.xlu0  ;;  %2126 = vmatprep.subr.bf16.mxu1 %v4366_v39  ;;  %2167 = vmatprep.subr.bf16.mxu0 %v4369_v40  ;;  %v405_v24 = vpop.trf.xlu1  ;;  %v4433_v39 = vld [vmem:[%s7035_s3 + $0x4b0] ss:$24 sps:$4 sm:$0xff]  }
 0x17d   :  { %565 = vmatmul.mubr.f32.gmra.mxu1 %v321_v43  ;;  %750 = vmatmul.mubr.f32.gmra.mxu0 %v321_v43  ;;  %v4436_v43 = vld [vmem:[%s7035_s3 + $0x180] ss:$24 sps:$4 sm:$0xff]  }
 0x17e   :  { %570 = vmatprep.mubr.f32.mxu1 %v4930_v1  ;;  %755 = vmatprep.mubr.f32.mxu0 %v4930_v1 }
 0x17f   :  { %2127 = vmatpush1.bf16.msra.mxu1 %v4364_v41  ;;  %2168 = vmatpush1.bf16.msra.mxu0 %v4367_v42  ;;  %v4438_v41 = vld [vmem:[%s7035_s3 + $0x184] ss:$24 sps:$4 sm:$0xff]  }
 0x180   :  { %v322_v48 = vpop.trf.xlu0  ;;  %2128 = vmatprep.subr.bf16.mxu1 %v4372_v44  ;;  %2169 = vmatprep.subr.bf16.mxu0 %v4375_v45  ;;  %v406_v9 = vpop.trf.xlu1  ;;  %v4441_v42 = vld [vmem:[%s7035_s3 + $0x484] ss:$24 sps:$4 sm:$0xff]   ;;  %v4439_v44 = vld [vmem:[%s7035_s3 + $0x480] ss:$24 sps:$4 sm:$0xff]  }
 0x181   :  { %571 = vmatmul.mubr.f32.gmra.mxu1 %v322_v48  ;;  %756 = vmatmul.mubr.f32.gmra.mxu0 %v322_v48  ;;  %v4444_v45 = vld [vmem:[%s7035_s3 + $0x15c] ss:$24 sps:$4 sm:$0xff]  }
 0x182   :  { %576 = vmatprep.mubr.f32.mxu1 %v4930_v1  ;;  %761 = vmatprep.mubr.f32.mxu0 %v4930_v1 }
 0x183   :  { %2129 = vmatpush1.bf16.msra.mxu1 %v4370_v46  ;;  %2170 = vmatpush1.bf16.msra.mxu0 %v4373_v47  ;;  %v4447_v46 = vld [vmem:[%s7035_s3 + $0x45c] ss:$24 sps:$4 sm:$0xff]  }
 0x184   :  { %v323_v3 = vpop.trf.xlu0  ;;  %2130 = vmatprep.subr.bf16.mxu1 %v4378_v51  ;;  %2171 = vmatprep.subr.bf16.mxu0 %v4381_v52  ;;  %v407_v33 = vpop.trf.xlu1  ;;  %v4926_v51 = vld [vmem:[%s7034_s1 + $0x108] sm:$0xff] }
 0x185   :  { %577 = vmatmul.mubr.f32.gmra.mxu1 %v323_v3  ;;  %762 = vmatmul.mubr.f32.gmra.mxu0 %v323_v3  ;;  %v5704_v52 = vpack.c.bf16 %v4926_v51, %v4926_v51  ;;  %v4520_v51 = vld [vmem:[%s7035_s3 + $0x1e8] ss:$24 sps:$4 sm:$0xff]  }
 0x186   :  { %582 = vmatprep.mubr.f32.mxu1 %v4930_v1  ;;  %767 = vmatprep.mubr.f32.mxu0 %v4930_v1 }
 0x187   :  { %2131 = vmatpush1.bf16.msra.mxu1 %v4376_v53  ;;  %2172 = vmatpush1.bf16.msra.mxu0 %v4379_v54  ;;  %v4927_v53 = vld [vmem:[%s7034_s1 + $0x118] sm:$0xff] }
 0x188   :  { %v324_v60 = vpop.trf.xlu0  ;;  %2132 = vmatprep.subr.bf16.mxu1 %v4384_v55  ;;  %2173 = vmatprep.subr.bf16.mxu0 %v4387_v56  ;;  %v408_v40 = vpop.trf.xlu1  ;;  %v5709_v54 = vpack.c.bf16 %v4927_v53, %v4927_v53  ;;  %v4928_v55 = vld [vmem:[%s7034_s1 + $0x100] sm:$0xff] }
 0x189   :  { %583 = vmatmul.mubr.f32.gmra.mxu1 %v324_v60  ;;  %768 = vmatmul.mubr.f32.gmra.mxu0 %v324_v60  ;;  %v5716_v56 = vpack.c.bf16 %v4928_v55, %v4928_v55  ;;  %v4450_v60 = vld [vmem:[%s7035_s3 + $0x12c] ss:$24 sps:$4 sm:$0xff]   ;;  %v4523_v53 = vld [vmem:[%s7035_s3 + $0x4e8] ss:$24 sps:$4 sm:$0xff]   ;;  %v4531_v55 = vld [vmem:[%s7035_s3 + $0x4bc] ss:$24 sps:$4 sm:$0xff]  }
 0x18a   :  { %588 = vmatprep.mubr.f32.mxu1 %v4930_v1  ;;  %773 = vmatprep.mubr.f32.mxu0 %v4930_v1 }
 0x18b   :  { %2133 = vmatpush1.bf16.msra.mxu1 %v4382_v58  ;;  %2174 = vmatpush1.bf16.msra.mxu0 %v4385_v59  ;;  %v4445_v59 = vld [vmem:[%s7035_s3 + $0x458] ss:$24 sps:$4 sm:$0xff]  }
 0x18c   :  { %v325_v63 = vpop.trf.xlu0  ;;  %2134 = vmatprep.subr.bf16.mxu1 %v4390_v23  ;;  %2175 = vmatprep.subr.bf16.mxu0 %v4393_v61  ;;  %v409_v47 = vpop.trf.xlu1  ;;  %v4453_v23 = vld [vmem:[%s7035_s3 + $0x42c] ss:$24 sps:$4 sm:$0xff]   ;;  %v4448_v61 = vld [vmem:[%s7035_s3 + $0x128] ss:$24 sps:$4 sm:$0xff]  }
 0x18d   :  { %589 = vmatmul.mubr.f32.gmra.mxu1 %v325_v63  ;;  %774 = vmatmul.mubr.f32.gmra.mxu0 %v325_v63  ;;  %v4454_v63 = vld [vmem:[%s7035_s3 + $0xf8] ss:$24 sps:$4 sm:$0xff]  }
 0x18e   :  { %594 = vmatprep.mubr.f32.mxu1 %v4930_v1  ;;  %779 = vmatprep.mubr.f32.mxu0 %v4930_v1 }
 0x18f   :  { %2135 = vmatpush1.bf16.msra.mxu1 %v4388_v62  ;;  %2176 = vmatpush1.bf16.msra.mxu0 %v4391_v21  ;;  %v4456_v62 = vld [vmem:[%s7035_s3 + $0xfc] ss:$24 sps:$4 sm:$0xff]  }
 0x190   :  { %v326_v18 = vpop.trf.xlu0  ;;  %2136 = vmatprep.subr.bf16.mxu1 %v4396_v20  ;;  %2177 = vmatprep.subr.bf16.mxu0 %v4399_v0  ;;  %v410_v48 = vpop.trf.xlu1  ;;  %v4459_v21 = vld [vmem:[%s7035_s3 + $0x3fc] ss:$24 sps:$4 sm:$0xff]   ;;  %v4457_v20 = vld [vmem:[%s7035_s3 + $0x3f8] ss:$24 sps:$4 sm:$0xff]   ;;  %v4462_v0 = vld [vmem:[%s7035_s3 + $0xcc] ss:$24 sps:$4 sm:$0xff]  }
 0x191   :  { %595 = vmatmul.mubr.f32.gmra.mxu1 %v326_v18  ;;  %780 = vmatmul.mubr.f32.gmra.mxu0 %v326_v18  ;;  %v4463_v18 = vld [vmem:[%s7035_s3 + $0x3c8] ss:$24 sps:$4 sm:$0xff]  }
 0x192   :  { %600 = vmatprep.mubr.f32.mxu1 %v4930_v1  ;;  %785 = vmatprep.mubr.f32.mxu0 %v4930_v1 }
 0x193   :  { %2137 = vmatpush2.bf16.msra.mxu1 %v4394_v19  ;;  %2178 = vmatpush2.bf16.msra.mxu0 %v4397_v2  ;;  %v4465_v19 = vld [vmem:[%s7035_s3 + $0x3cc] ss:$24 sps:$4 sm:$0xff]   ;;  %v4460_v2 = vld [vmem:[%s7035_s3 + $0xc8] ss:$24 sps:$4 sm:$0xff]  }
 0x194   :  { %v327_v15 = vpop.trf.xlu0  ;;  %2138 = vmatprep.subr.bf16.mxu1 %v4402_v5  ;;  %2179 = vmatprep.subr.bf16.mxu0 %v4405_v17  ;;  %v411_v3 = vpop.trf.xlu1  ;;  %v4468_v5 = vld [vmem:[%s7035_s3 + $0x9c] ss:$24 sps:$4 sm:$0xff]  }
 0x195   :  { %601 = vmatmul.mubr.f32.gmra.mxu1 %v327_v15  ;;  %786 = vmatmul.mubr.f32.gmra.mxu0 %v327_v15  ;;  %v4471_v17 = vld [vmem:[%s7035_s3 + $0x39c] ss:$24 sps:$4 sm:$0xff]   ;;  %v4477_v15 = vld [vmem:[%s7035_s3 + $0x36c] ss:$24 sps:$4 sm:$0xff]  }
 0x196   :  { %606 = vmatprep.mubr.f32.mxu1 %v4930_v1  ;;  %791 = vmatprep.mubr.f32.mxu0 %v4930_v1 }
 0x197   :  { %2139 = vmatpush2.bf16.msra.mxu1 %v4400_v16  ;;  %2180 = vmatpush2.bf16.msra.mxu0 %v4403_v8  ;;  %v4469_v16 = vld [vmem:[%s7035_s3 + $0x398] ss:$24 sps:$4 sm:$0xff]   ;;  %v4474_v8 = vld [vmem:[%s7035_s3 + $0x6c] ss:$24 sps:$4 sm:$0xff]  }
 0x198   :  { %2140 = vmatprep.subr.bf16.mxu1 %v4408_v13  ;;  %2181 = vmatprep.subr.bf16.mxu0 %v4411_v14  ;;  %v4472_v13 = vld [vmem:[%s7035_s3 + $0x68] ss:$24 sps:$4 sm:$0xff]  }
 0x199   :  { %607 = vmatmul.mubr.f32.gmra.mxu1 %v5547_v57  ;;  %792 = vmatmul.mubr.f32.gmra.mxu0 %v5547_v57  ;;  %v4929_v57 = vld [vmem:[%s7034_s1 + $0x110] sm:$0xff]  ;;  %v4475_v14 = vld [vmem:[%s7035_s3 + $0x368] ss:$24 sps:$4 sm:$0xff]  }
 0x19a   :  { %612 = vmatprep.mubr.f32.mxu1 %v4930_v1  ;;  %797 = vmatprep.mubr.f32.mxu0 %v4930_v1  ;;  %v5721_v58 = vpack.c.bf16 %v4929_v57, %v4929_v57  ;;  %v4526_v57 = vld [vmem:[%s7035_s3 + $0x1b8] ss:$24 sps:$4 sm:$0xff]  }
 0x19b   :  { %2141 = vmatpush2.bf16.msra.mxu1 %v4406_v12  ;;  %2182 = vmatpush2.bf16.msra.mxu0 %v4409_v25  ;;  %v4483_v12 = vld [vmem:[%s7035_s3 + $0x33c] ss:$24 sps:$4 sm:$0xff]   ;;  %v4478_v25 = vld [vmem:[%s7035_s3 + $0x38] ss:$24 sps:$4 sm:$0xff]  }
 0x19c   :  { %2142 = vmatprep.subr.bf16.mxu1 %v4414_v11  ;;  %2183 = vmatprep.subr.bf16.mxu0 %v4417_v26  ;;  %v4481_v11 = vld [vmem:[%s7035_s3 + $0x338] ss:$24 sps:$4 sm:$0xff]   ;;  %v4486_v26 = vld [vmem:[%s7035_s3 + $0xc] ss:$24 sps:$4 sm:$0xff]  }
 0x19d   :  { %613 = vmatmul.mubr.f32.gmra.mxu1 %v5565_v22  ;;  %798 = vmatmul.mubr.f32.gmra.mxu0 %v5565_v22  ;;  %v4451_v22 = vld [vmem:[%s7035_s3 + $0x428] ss:$24 sps:$4 sm:$0xff]  }
 0x19e   :  { %618 = vmatprep.mubr.f32.mxu1 %v4930_v1  ;;  %803 = vmatprep.mubr.f32.mxu0 %v4930_v1 }
 0x19f   :  { %2143 = vmatpush2.bf16.msra.mxu1 %v4412_v10  ;;  %2184 = vmatpush2.bf16.msra.mxu0 %v4415_v27  ;;  %v4489_v10 = vld [vmem:[%s7035_s3 + $0x30c] ss:$24 sps:$4 sm:$0xff]   ;;  %v4484_v27 = vld [vmem:[%s7035_s3 + $0x8] ss:$24 sps:$4 sm:$0xff]  }
 0x1a0   :  { %2144 = vmatprep.subr.bf16.mxu1 %v4420_v28  ;;  %2185 = vmatprep.subr.bf16.mxu0 %v4423_v29  ;;  %v4492_v28 = vld [vmem:[%s7035_s3 + $0x2dc] ss:$24 sps:$4 sm:$0xff]  }
 0x1a1   :  { %619 = vmatmul.mubr.f32.gmra.mxu1 %v404_v7  ;;  %804 = vmatmul.mubr.f32.gmra.mxu0 %v404_v7  ;;  %v4466_v7 = vld [vmem:[%s7035_s3 + $0x98] ss:$24 sps:$4 sm:$0xff]   ;;  %v4495_v29 = vld [vmem:[%s7035_s3 + $0x5dc] ss:$24 sps:$4 sm:$0xff]  }
 0x1a2   :  { %624 = vmatprep.mubr.f32.mxu1 %v4930_v1  ;;  %809 = vmatprep.mubr.f32.mxu0 %v4930_v1 }
 0x1a3   :  { %2145 = vmatpush2.bf16.msra.mxu1 %v4418_v30  ;;  %2186 = vmatpush2.bf16.msra.mxu0 %v4421_v6  ;;  %v4490_v30 = vld [vmem:[%s7035_s3 + $0x2d8] ss:$24 sps:$4 sm:$0xff]  }
 0x1a4   :  { %2146 = vmatprep.subr.bf16.mxu1 %v4426_v31  ;;  %2187 = vmatprep.subr.bf16.mxu0 %v4429_v32  ;;  %v4493_v6 = vld [vmem:[%s7035_s3 + $0x5d8] ss:$24 sps:$4 sm:$0xff]   ;;  %v4498_v31 = vld [vmem:[%s7035_s3 + $0x2ac] ss:$24 sps:$4 sm:$0xff]  }
 0x1a5   :  { %625 = vmatmul.mubr.f32.gmra.mxu1 %v405_v24  ;;  %810 = vmatmul.mubr.f32.gmra.mxu0 %v405_v24  ;;  %v4480_v24 = vld [vmem:[%s7035_s3 + $0x3c] ss:$24 sps:$4 sm:$0xff]   ;;  %v4501_v32 = vld [vmem:[%s7035_s3 + $0x5ac] ss:$24 sps:$4 sm:$0xff]  }
 0x1a6   :  { %630 = vmatprep.mubr.f32.mxu1 %v4930_v1  ;;  %815 = vmatprep.mubr.f32.mxu0 %v4930_v1 }
 0x1a7   :  { %2147 = vmatpush2.bf16.msra.mxu1 %v4424_v34  ;;  %2188 = vmatpush2.bf16.msra.mxu0 %v4427_v35  ;;  %v4499_v34 = vld [vmem:[%s7035_s3 + $0x5a8] ss:$24 sps:$4 sm:$0xff]   ;;  %v4504_v35 = vld [vmem:[%s7035_s3 + $0x27c] ss:$24 sps:$4 sm:$0xff]  }
 0x1a8   :  { %2148 = vmatprep.subr.bf16.mxu1 %v4432_v36  ;;  %2189 = vmatprep.subr.bf16.mxu0 %v4435_v37  ;;  %v4507_v36 = vld [vmem:[%s7035_s3 + $0x57c] ss:$24 sps:$4 sm:$0xff]   ;;  %v4502_v37 = vld [vmem:[%s7035_s3 + $0x278] ss:$24 sps:$4 sm:$0xff]  }
 0x1a9   :  { %631 = vmatmul.mubr.f32.gmra.mxu1 %v406_v9  ;;  %816 = vmatmul.mubr.f32.gmra.mxu0 %v406_v9  ;;  %v4487_v9 = vld [vmem:[%s7035_s3 + $0x308] ss:$24 sps:$4 sm:$0xff]  }
 0x1aa   :  { %636 = vmatprep.mubr.f32.mxu1 %v4930_v1  ;;  %821 = vmatprep.mubr.f32.mxu0 %v4930_v1 }
 0x1ab   :  { %2149 = vmatpush2.bf16.msra.mxu1 %v4430_v38  ;;  %2190 = vmatpush2.bf16.msra.mxu0 %v4433_v39  ;;  %v4505_v38 = vld [vmem:[%s7035_s3 + $0x578] ss:$24 sps:$4 sm:$0xff]   ;;  %v4510_v39 = vld [vmem:[%s7035_s3 + $0x24c] ss:$24 sps:$4 sm:$0xff]  }
 0x1ac   :  { %2150 = vmatprep.subr.bf16.mxu1 %v4438_v41  ;;  %2191 = vmatprep.subr.bf16.mxu0 %v4441_v42  ;;  %v4508_v41 = vld [vmem:[%s7035_s3 + $0x248] ss:$24 sps:$4 sm:$0xff]  }
 0x1ad   :  { %637 = vmatmul.mubr.f32.gmra.mxu1 %v407_v33  ;;  %822 = vmatmul.mubr.f32.gmra.mxu0 %v407_v33  ;;  %v4496_v33 = vld [vmem:[%s7035_s3 + $0x2a8] ss:$24 sps:$4 sm:$0xff]  }
 0x1ae   :  { %642 = vmatprep.mubr.f32.mxu1 %v4930_v1  ;;  %827 = vmatprep.mubr.f32.mxu0 %v4930_v1  ;;  %v4511_v42 = vld [vmem:[%s7035_s3 + $0x548] ss:$24 sps:$4 sm:$0xff]  }
 0x1af   :  { %2151 = vmatpush2.bf16.msra.mxu1 %v4436_v43  ;;  %2192 = vmatpush2.bf16.msra.mxu0 %v4439_v44  ;;  %v4516_v43 = vld [vmem:[%s7035_s3 + $0x21c] ss:$24 sps:$4 sm:$0xff]  }
 0x1b0   :  { %2202 = vmatprep.subr.bf16.mxu1 %v4444_v45  ;;  %2243 = vmatprep.subr.bf16.mxu0 %v4447_v46  ;;  %v4519_v44 = vld [vmem:[%s7035_s3 + $0x51c] ss:$24 sps:$4 sm:$0xff]   ;;  %v4514_v45 = vld [vmem:[%s7035_s3 + $0x218] ss:$24 sps:$4 sm:$0xff]  }
 0x1b1   :  { %643 = vmatmul.mubr.f32.gmra.mxu1 %v408_v40  ;;  %828 = vmatmul.mubr.f32.gmra.mxu0 %v408_v40  ;;  %v4513_v40 = vld [vmem:[%s7035_s3 + $0x54c] ss:$24 sps:$4 sm:$0xff]   ;;  %v4517_v46 = vld [vmem:[%s7035_s3 + $0x518] ss:$24 sps:$4 sm:$0xff]  }
 0x1b2   :  { %648 = vmatprep.mubr.f32.mxu1 %v4930_v1  ;;  %833 = vmatprep.mubr.f32.mxu0 %v4930_v1 }
 0x1b5   :  { %649 = vmatmul.mubr.f32.gmra.mxu1 %v409_v47  ;;  %834 = vmatmul.mubr.f32.gmra.mxu0 %v409_v47  ;;  %v4522_v47 = vld [vmem:[%s7035_s3 + $0x1ec] ss:$24 sps:$4 sm:$0xff]  }
 0x1b6   :  { %654 = vmatprep.mubr.f32.mxu1 %v4930_v1  ;;  %839 = vmatprep.mubr.f32.mxu0 %v4930_v1 }
 0x1b9   :  { %655 = vmatmul.mubr.f32.gmra.mxu1 %v410_v48  ;;  %840 = vmatmul.mubr.f32.gmra.mxu0 %v410_v48  ;;  %v4525_v48 = vld [vmem:[%s7035_s3 + $0x4ec] ss:$24 sps:$4 sm:$0xff]  }
 0x1ba   :  { %660 = vmatprep.mubr.f32.mxu1 %v4930_v1  ;;  %845 = vmatprep.mubr.f32.mxu0 %v4930_v1  ;;  %v4442_v1 = vld [vmem:[%s7035_s3 + $0x158] ss:$24 sps:$4 sm:$0xff]  }
 0x1bd   :  { %661 = vmatmul.mubr.f32.gmra.mxu1 %v411_v3  ;;  %846 = vmatmul.mubr.f32.gmra.mxu0 %v411_v3  ;;  %v4528_v3 = vld [vmem:[%s7035_s3 + $0x1bc] ss:$24 sps:$4 sm:$0xff]  }
 0x1be   :  { %2152 = vmatprep.mubr.bf16.mxu1 %v5704_v52  ;;  %2193 = vmatprep.mubr.bf16.mxu0 %v5709_v54 }
 0x1c1   :  { %2153 = vmatmul.mubr.bf16.vlgmr.msra.gmra.mxu1 %v5716_v56  ;;  %2194 = vmatmul.mubr.bf16.vlgmr.msra.gmra.mxu0 %v5721_v58 }
 0x1c2   :  { %2203 = vmatpush1.bf16.msra.mxu1 %v4442_v1  ;;  %2244 = vmatpush1.bf16.msra.mxu0 %v4445_v59  ;;  %v4529_v1 = vld [vmem:[%s7035_s3 + $0x4b8] ss:$24 sps:$4 sm:$0xff]   ;;  %v4534_v59 = vld [vmem:[%s7035_s3 + $0x18c] ss:$24 sps:$4 sm:$0xff]  }
 0x1c3   :  { %2204 = vmatprep.subr.bf16.mxu1 %v4450_v60  ;;  %2245 = vmatprep.subr.bf16.mxu0 %v4453_v23  ;;  %v4537_v60 = vld [vmem:[%s7035_s3 + $0x48c] ss:$24 sps:$4 sm:$0xff]   ;;  %v4532_v23 = vld [vmem:[%s7035_s3 + $0x188] ss:$24 sps:$4 sm:$0xff]  }
 0x1c4   :  { %2234 = vmatprep.mubr.bf16.mxu1 %v5704_v52  ;;  %2275 = vmatprep.mubr.bf16.mxu0 %v5709_v54 }
 0x1c6   :  { %2205 = vmatpush1.bf16.msra.mxu1 %v4448_v61  ;;  %2246 = vmatpush1.bf16.msra.mxu0 %v4451_v22  ;;  %v4535_v61 = vld [vmem:[%s7035_s3 + $0x488] ss:$24 sps:$4 sm:$0xff]   ;;  %v4540_v22 = vld [vmem:[%s7035_s3 + $0x164] ss:$24 sps:$4 sm:$0xff]  }
 0x1c7   :  { %2206 = vmatprep.subr.bf16.mxu1 %v4456_v62  ;;  %2247 = vmatprep.subr.bf16.mxu0 %v4459_v21  ;;  %v4543_v62 = vld [vmem:[%s7035_s3 + $0x464] ss:$24 sps:$4 sm:$0xff]   ;;  %v4538_v21 = vld [vmem:[%s7035_s3 + $0x160] ss:$24 sps:$4 sm:$0xff]  }
 0x1ca   :  { %2207 = vmatpush1.bf16.msra.mxu1 %v4454_v63  ;;  %2248 = vmatpush1.bf16.msra.mxu0 %v4457_v20  ;;  %v4541_v63 = vld [vmem:[%s7035_s3 + $0x460] ss:$24 sps:$4 sm:$0xff]   ;;  %v4546_v20 = vld [vmem:[%s7035_s3 + $0x134] ss:$24 sps:$4 sm:$0xff]  }
 0x1cb   :  { %2208 = vmatprep.subr.bf16.mxu1 %v4462_v0  ;;  %2249 = vmatprep.subr.bf16.mxu0 %v4465_v19  ;;  %v4549_v0 = vld [vmem:[%s7035_s3 + $0x434] ss:$24 sps:$4 sm:$0xff]   ;;  %v4544_v19 = vld [vmem:[%s7035_s3 + $0x130] ss:$24 sps:$4 sm:$0xff]  }
 0x1ce   :  { %2209 = vmatpush1.bf16.msra.mxu1 %v4460_v2  ;;  %2250 = vmatpush1.bf16.msra.mxu0 %v4463_v18  ;;  %v4547_v2 = vld [vmem:[%s7035_s3 + $0x430] ss:$24 sps:$4 sm:$0xff]   ;;  %v4552_v18 = vld [vmem:[%s7035_s3 + $0x104] ss:$24 sps:$4 sm:$0xff]  }
 0x1cf   :  { %2210 = vmatprep.subr.bf16.mxu1 %v4468_v5  ;;  %2251 = vmatprep.subr.bf16.mxu0 %v4471_v17  ;;  %v4555_v5 = vld [vmem:[%s7035_s3 + $0x404] ss:$24 sps:$4 sm:$0xff]   ;;  %v4550_v17 = vld [vmem:[%s7035_s3 + $0x100] ss:$24 sps:$4 sm:$0xff]  }
 0x1d2   :  { %2211 = vmatpush1.bf16.msra.mxu1 %v4466_v7  ;;  %2252 = vmatpush1.bf16.msra.mxu0 %v4469_v16  ;;  %v4553_v7 = vld [vmem:[%s7035_s3 + $0x400] ss:$24 sps:$4 sm:$0xff]   ;;  %v4558_v16 = vld [vmem:[%s7035_s3 + $0xd4] ss:$24 sps:$4 sm:$0xff]  }
 0x1d3   :  { %2212 = vmatprep.subr.bf16.mxu1 %v4474_v8  ;;  %2253 = vmatprep.subr.bf16.mxu0 %v4477_v15  ;;  %v4561_v8 = vld [vmem:[%s7035_s3 + $0x3d4] ss:$24 sps:$4 sm:$0xff]   ;;  %v4564_v15 = vld [vmem:[%s7035_s3 + $0xa4] ss:$24 sps:$4 sm:$0xff]  }
 0x1d6   :  { %2213 = vmatpush1.bf16.msra.mxu1 %v4472_v13  ;;  %2254 = vmatpush1.bf16.msra.mxu0 %v4475_v14  ;;  %v4567_v13 = vld [vmem:[%s7035_s3 + $0x3a4] ss:$24 sps:$4 sm:$0xff]   ;;  %v4562_v14 = vld [vmem:[%s7035_s3 + $0xa0] ss:$24 sps:$4 sm:$0xff]  }
 0x1d7   :  { %2214 = vmatprep.subr.bf16.mxu1 %v4480_v24  ;;  %2255 = vmatprep.subr.bf16.mxu0 %v4483_v12  ;;  %v4565_v24 = vld [vmem:[%s7035_s3 + $0x3a0] ss:$24 sps:$4 sm:$0xff]   ;;  %v4570_v12 = vld [vmem:[%s7035_s3 + $0x74] ss:$24 sps:$4 sm:$0xff]  }
 0x1da   :  { %2215 = vmatpush1.bf16.msra.mxu1 %v4478_v25  ;;  %2256 = vmatpush1.bf16.msra.mxu0 %v4481_v11  ;;  %v4573_v25 = vld [vmem:[%s7035_s3 + $0x374] ss:$24 sps:$4 sm:$0xff]   ;;  %v4568_v11 = vld [vmem:[%s7035_s3 + $0x70] ss:$24 sps:$4 sm:$0xff]  }
 0x1db   :  { %2216 = vmatprep.subr.bf16.mxu1 %v4486_v26  ;;  %2257 = vmatprep.subr.bf16.mxu0 %v4489_v10  ;;  %v4571_v26 = vld [vmem:[%s7035_s3 + $0x370] ss:$24 sps:$4 sm:$0xff]   ;;  %v4576_v10 = vld [vmem:[%s7035_s3 + $0x44] ss:$24 sps:$4 sm:$0xff]  }
 0x1de   :  { %2217 = vmatpush1.bf16.msra.mxu1 %v4484_v27  ;;  %2258 = vmatpush1.bf16.msra.mxu0 %v4487_v9  ;;  %v4579_v27 = vld [vmem:[%s7035_s3 + $0x344] ss:$24 sps:$4 sm:$0xff]   ;;  %v4574_v9 = vld [vmem:[%s7035_s3 + $0x40] ss:$24 sps:$4 sm:$0xff]  }
 0x1df   :  { %2218 = vmatprep.subr.bf16.mxu1 %v4492_v28  ;;  %2259 = vmatprep.subr.bf16.mxu0 %v4495_v29  ;;  %v4577_v28 = vld [vmem:[%s7035_s3 + $0x340] ss:$24 sps:$4 sm:$0xff]   ;;  %v4582_v29 = vld [vmem:[%s7035_s3 + $0x14] ss:$24 sps:$4 sm:$0xff]  }
 0x1e2   :  { %2219 = vmatpush2.bf16.msra.mxu1 %v4490_v30  ;;  %2260 = vmatpush2.bf16.msra.mxu0 %v4493_v6  ;;  %v4585_v30 = vld [vmem:[%s7035_s3 + $0x314] ss:$24 sps:$4 sm:$0xff]   ;;  %v4580_v6 = vld [vmem:[%s7035_s3 + $0x10] ss:$24 sps:$4 sm:$0xff]  }
 0x1e3   :  { %2220 = vmatprep.subr.bf16.mxu1 %v4498_v31  ;;  %2261 = vmatprep.subr.bf16.mxu0 %v4501_v32  ;;  %v4583_v31 = vld [vmem:[%s7035_s3 + $0x310] ss:$24 sps:$4 sm:$0xff]   ;;  %v4588_v32 = vld [vmem:[%s7035_s3 + $0x2e4] ss:$24 sps:$4 sm:$0xff]  }
 0x1e6   :  { %2221 = vmatpush2.bf16.msra.mxu1 %v4496_v33  ;;  %2262 = vmatpush2.bf16.msra.mxu0 %v4499_v34  ;;  %v4591_v33 = vld [vmem:[%s7035_s3 + $0x5e4] ss:$24 sps:$4 sm:$0xff]   ;;  %v4586_v34 = vld [vmem:[%s7035_s3 + $0x2e0] ss:$24 sps:$4 sm:$0xff]  }
 0x1e7   :  { %2222 = vmatprep.subr.bf16.mxu1 %v4504_v35  ;;  %2263 = vmatprep.subr.bf16.mxu0 %v4507_v36  ;;  %v4589_v35 = vld [vmem:[%s7035_s3 + $0x5e0] ss:$24 sps:$4 sm:$0xff]   ;;  %v4594_v36 = vld [vmem:[%s7035_s3 + $0x2b4] ss:$24 sps:$4 sm:$0xff]  }
 0x1ea   :  { %2223 = vmatpush2.bf16.msra.mxu1 %v4502_v37  ;;  %2264 = vmatpush2.bf16.msra.mxu0 %v4505_v38  ;;  %v4597_v37 = vld [vmem:[%s7035_s3 + $0x5b4] ss:$24 sps:$4 sm:$0xff]   ;;  %v4592_v38 = vld [vmem:[%s7035_s3 + $0x2b0] ss:$24 sps:$4 sm:$0xff]  }
 0x1eb   :  { %2224 = vmatprep.subr.bf16.mxu1 %v4510_v39  ;;  %2265 = vmatprep.subr.bf16.mxu0 %v4513_v40  ;;  %v4595_v39 = vld [vmem:[%s7035_s3 + $0x5b0] ss:$24 sps:$4 sm:$0xff]   ;;  %v4600_v40 = vld [vmem:[%s7035_s3 + $0x284] ss:$24 sps:$4 sm:$0xff]  }
 0x1ee   :  { %2225 = vmatpush2.bf16.msra.mxu1 %v4508_v41  ;;  %2266 = vmatpush2.bf16.msra.mxu0 %v4511_v42  ;;  %v4603_v41 = vld [vmem:[%s7035_s3 + $0x584] ss:$24 sps:$4 sm:$0xff]   ;;  %v4598_v42 = vld [vmem:[%s7035_s3 + $0x280] ss:$24 sps:$4 sm:$0xff]  }
 0x1ef   :  { %2226 = vmatprep.subr.bf16.mxu1 %v4516_v43  ;;  %2267 = vmatprep.subr.bf16.mxu0 %v4519_v44  ;;  %v4601_v43 = vld [vmem:[%s7035_s3 + $0x580] ss:$24 sps:$4 sm:$0xff]   ;;  %v4606_v44 = vld [vmem:[%s7035_s3 + $0x254] ss:$24 sps:$4 sm:$0xff]  }
 0x1f2   :  { %2227 = vmatpush2.bf16.msra.mxu1 %v4514_v45  ;;  %2268 = vmatpush2.bf16.msra.mxu0 %v4517_v46  ;;  %v4609_v45 = vld [vmem:[%s7035_s3 + $0x554] ss:$24 sps:$4 sm:$0xff]   ;;  %v4604_v46 = vld [vmem:[%s7035_s3 + $0x250] ss:$24 sps:$4 sm:$0xff]  }
 0x1f3   :  { %2228 = vmatprep.subr.bf16.mxu1 %v4522_v47  ;;  %2269 = vmatprep.subr.bf16.mxu0 %v4525_v48  ;;  %v4607_v47 = vld [vmem:[%s7035_s3 + $0x550] ss:$24 sps:$4 sm:$0xff]   ;;  %v4612_v48 = vld [vmem:[%s7035_s3 + $0x224] ss:$24 sps:$4 sm:$0xff]  }
 0x1f6   :  { %2229 = vmatpush2.bf16.msra.mxu1 %v4520_v51  ;;  %2270 = vmatpush2.bf16.msra.mxu0 %v4523_v53  ;;  %v4615_v51 = vld [vmem:[%s7035_s3 + $0x524] ss:$24 sps:$4 sm:$0xff]   ;;  %v4610_v53 = vld [vmem:[%s7035_s3 + $0x220] ss:$24 sps:$4 sm:$0xff]  }
 0x1f7   :  { %2230 = vmatprep.subr.bf16.mxu1 %v4528_v3  ;;  %2271 = vmatprep.subr.bf16.mxu0 %v4531_v55  ;;  %v4613_v3 = vld [vmem:[%s7035_s3 + $0x520] ss:$24 sps:$4 sm:$0xff]   ;;  %v4618_v55 = vld [vmem:[%s7035_s3 + $0x1f4] ss:$24 sps:$4 sm:$0xff]  }
 0x1fa   :  { %2231 = vmatpush2.bf16.msra.mxu1 %v4526_v57  ;;  %2272 = vmatpush2.bf16.msra.mxu0 %v4529_v1  ;;  %v4621_v57 = vld [vmem:[%s7035_s3 + $0x4f4] ss:$24 sps:$4 sm:$0xff]  }
 0x1fb   :  { %2232 = vmatprep.subr.bf16.mxu1 %v4534_v59  ;;  %2273 = vmatprep.subr.bf16.mxu0 %v4537_v60  ;;  %v4616_v60 = vld [vmem:[%s7035_s3 + $0x1f0] ss:$24 sps:$4 sm:$0xff]  }
 0x1fe   :  { %2233 = vmatpush2.bf16.msra.mxu1 %v4532_v23  ;;  %2274 = vmatpush2.bf16.msra.mxu0 %v4535_v61  ;;  %v4619_v23 = vld [vmem:[%s7035_s3 + $0x4f0] ss:$24 sps:$4 sm:$0xff]  }
 0x1ff   :  { %2284 = vmatprep.subr.bf16.mxu1 %v4540_v22  ;;  %2325 = vmatprep.subr.bf16.mxu0 %v4543_v62  ;;  %v4624_v62 = vld [vmem:[%s7035_s3 + $0x1c4] ss:$24 sps:$4 sm:$0xff]  }
 0x201   :  { %2235 = vmatmul.mubr.bf16.vlgmr.msra.gmra.mxu1 %v5716_v56  ;;  %2276 = vmatmul.mubr.bf16.vlgmr.msra.gmra.mxu0 %v5721_v58 }
 0x202   :  { %2285 = vmatpush1.bf16.msra.mxu1 %v4538_v21  ;;  %2326 = vmatpush1.bf16.msra.mxu0 %v4541_v63  ;;  %v4627_v21 = vld [vmem:[%s7035_s3 + $0x4c4] ss:$24 sps:$4 sm:$0xff]  }
 0x203   :  { %2286 = vmatprep.subr.bf16.mxu1 %v4546_v20  ;;  %2327 = vmatprep.subr.bf16.mxu0 %v4549_v0  ;;  %v4622_v0 = vld [vmem:[%s7035_s3 + $0x1c0] ss:$24 sps:$4 sm:$0xff]  }
 0x204   :  { %2316 = vmatprep.mubr.bf16.mxu1 %v5704_v52  ;;  %2357 = vmatprep.mubr.bf16.mxu0 %v5709_v54  ;;  %v4556_v52 = vld [vmem:[%s7035_s3 + $0xd0] ss:$24 sps:$4 sm:$0xff]  }
 0x205   :  { %v4559_v54 = vld [vmem:[%s7035_s3 + $0x3d0] ss:$24 sps:$4 sm:$0xff]  }
 0x206   :  { %2287 = vmatpush1.bf16.msra.mxu1 %v4544_v19  ;;  %2328 = vmatpush1.bf16.msra.mxu0 %v4547_v2  ;;  %v4625_v19 = vld [vmem:[%s7035_s3 + $0x4c0] ss:$24 sps:$4 sm:$0xff]  }
 0x207   :  { %2288 = vmatprep.subr.bf16.mxu1 %v4552_v18  ;;  %2329 = vmatprep.subr.bf16.mxu0 %v4555_v5  ;;  %v4630_v5 = vld [vmem:[%s7035_s3 + $0x194] ss:$24 sps:$4 sm:$0xff]  }
 0x20a   :  { %2289 = vmatpush1.bf16.msra.mxu1 %v4550_v17  ;;  %2330 = vmatpush1.bf16.msra.mxu0 %v4553_v7  ;;  %v4633_v17 = vld [vmem:[%s7035_s3 + $0x494] ss:$24 sps:$4 sm:$0xff]  }
 0x20b   :  { %2290 = vmatprep.subr.bf16.mxu1 %v4558_v16  ;;  %2331 = vmatprep.subr.bf16.mxu0 %v4561_v8  ;;  %v4628_v8 = vld [vmem:[%s7035_s3 + $0x190] ss:$24 sps:$4 sm:$0xff]  }
 0x20e   :  { %2291 = vmatpush1.bf16.msra.mxu1 %v4556_v52  ;;  %2332 = vmatpush1.bf16.msra.mxu0 %v4559_v54  ;;  %v4631_v52 = vld [vmem:[%s7035_s3 + $0x490] ss:$24 sps:$4 sm:$0xff]  }
 0x20f   :  { %2292 = vmatprep.subr.bf16.mxu1 %v4564_v15  ;;  %2333 = vmatprep.subr.bf16.mxu0 %v4567_v13  ;;  %v4636_v13 = vld [vmem:[%s7037_s5 + $0x154] ss:$24 sps:$4 sm:$0xff]  }
 0x212   :  { %2293 = vmatpush1.bf16.msra.mxu1 %v4562_v14  ;;  %2334 = vmatpush1.bf16.msra.mxu0 %v4565_v24  ;;  %v4639_v14 = vld [vmem:[%s7037_s5 + $0x454] ss:$24 sps:$4 sm:$0xff]  }
 0x213   :  { %2294 = vmatprep.subr.bf16.mxu1 %v4570_v12  ;;  %2335 = vmatprep.subr.bf16.mxu0 %v4573_v25  ;;  %v6156_v25 = vld [vmem:[%s7039_s2] sm:$0xff] }
 0x216   :  { %2295 = vmatpush1.bf16.msra.mxu1 %v4568_v11  ;;  %2336 = vmatpush1.bf16.msra.mxu0 %v4571_v26  ;;  %v6161_v11 = vld [vmem:[%s7039_s2 + $0x8] sm:$0xff] }
 0x217   :  { %2296 = vmatprep.subr.bf16.mxu1 %v4576_v10  ;;  %2337 = vmatprep.subr.bf16.mxu0 %v4579_v27  ;;  %v4634_v26 = vld [vmem:[%s7037_s5 + $0x150] ss:$24 sps:$4 sm:$0xff]  }
 0x218   :  { %v4637_v10 = vld [vmem:[%s7037_s5 + $0x450] ss:$24 sps:$4 sm:$0xff]  }
 0x21a   :  { %2297 = vmatpush1.bf16.msra.mxu1 %v4574_v9  ;;  %2338 = vmatpush1.bf16.msra.mxu0 %v4577_v28  ;;  %v4642_v28 = vld [vmem:[%s7037_s5 + $0x124] ss:$24 sps:$4 sm:$0xff]  }
 0x21b   :  { %2298 = vmatprep.subr.bf16.mxu1 %v4582_v29  ;;  %2339 = vmatprep.subr.bf16.mxu0 %v4585_v30  ;;  %v4645_v29 = vld [vmem:[%s7037_s5 + $0x424] ss:$24 sps:$4 sm:$0xff]   ;;  %v6189_v30 = vcombine.high %v6156_v25, %v6156_v25 }
 0x21e   :  { %2299 = vmatpush1.bf16.msra.mxu1 %v4580_v6  ;;  %2340 = vmatpush1.bf16.msra.mxu0 %v4583_v31  ;;  %v6193_v6 = vcombine.high %v6161_v11, %v6161_v11 }
 0x21f   :  { %2300 = vmatprep.subr.bf16.mxu1 %v4588_v32  ;;  %2341 = vmatprep.subr.bf16.mxu0 %v4591_v33  ;;  %v4640_v33 = vld [vmem:[%s7037_s5 + $0x120] ss:$24 sps:$4 sm:$0xff]  }
 0x222   :  { %2301 = vmatpush2.bf16.msra.mxu1 %v4586_v34  ;;  %2342 = vmatpush2.bf16.msra.mxu0 %v4589_v35  ;;  %v4648_v35 = vld [vmem:[%s7037_s5 + $0xf4] ss:$24 sps:$4 sm:$0xff]  }
 0x223   :  { %2302 = vmatprep.subr.bf16.mxu1 %v4594_v36  ;;  %2343 = vmatprep.subr.bf16.mxu0 %v4597_v37  ;;  %v4651_v36 = vld [vmem:[%s7037_s5 + $0x3f4] ss:$24 sps:$4 sm:$0xff]  }
 0x226   :  { %2303 = vmatpush2.bf16.msra.mxu1 %v4592_v38  ;;  %2344 = vmatpush2.bf16.msra.mxu0 %v4595_v39  ;;  %v4646_v39 = vld [vmem:[%s7037_s5 + $0xf0] ss:$24 sps:$4 sm:$0xff]  }
 0x227   :  { %2304 = vmatprep.subr.bf16.mxu1 %v4600_v40  ;;  %2345 = vmatprep.subr.bf16.mxu0 %v4603_v41  ;;  %v4649_v40 = vld [vmem:[%s7037_s5 + $0x3f0] ss:$24 sps:$4 sm:$0xff]  }
 0x22a   :  { %2305 = vmatpush2.bf16.msra.mxu1 %v4598_v42  ;;  %2346 = vmatpush2.bf16.msra.mxu0 %v4601_v43  ;;  %v4654_v43 = vld [vmem:[%s7037_s5 + $0xc4] ss:$24 sps:$4 sm:$0xff]  }
 0x22b   :  { %2306 = vmatprep.subr.bf16.mxu1 %v4606_v44  ;;  %2347 = vmatprep.subr.bf16.mxu0 %v4609_v45  ;;  %v4657_v44 = vld [vmem:[%s7037_s5 + $0x3c4] ss:$24 sps:$4 sm:$0xff]  }
 0x22e   :  { %2307 = vmatpush2.bf16.msra.mxu1 %v4604_v46  ;;  %2348 = vmatpush2.bf16.msra.mxu0 %v4607_v47  ;;  %v4652_v47 = vld [vmem:[%s7037_s5 + $0xc0] ss:$24 sps:$4 sm:$0xff]  }
 0x22f   :  { %2308 = vmatprep.subr.bf16.mxu1 %v4612_v48  ;;  %2349 = vmatprep.subr.bf16.mxu0 %v4615_v51  ;;  %v4655_v48 = vld [vmem:[%s7037_s5 + $0x3c0] ss:$24 sps:$4 sm:$0xff]  }
 0x231   :  { %v548_v1 = vpop.f32.mrf.mxu1  ;;  %v733_v59 = vpop.f32.mrf.mxu0 }
 0x232   :  { %852 = vst [vmem:[%s7038_s7] sm:$0xff] %v548_v1  ;;  %854 = vst [vmem:[%s7038_s7 + $0x10] sm:$0xff] %v733_v59  ;;  %2309 = vmatpush2.bf16.msra.mxu1 %v4610_v53  ;;  %2350 = vmatpush2.bf16.msra.mxu0 %v4613_v3  ;;  %v4660_v3 = vld [vmem:[%s7037_s5 + $0x94] ss:$24 sps:$4 sm:$0xff]   ;;  %v4658_v59 = vld [vmem:[%s7037_s5 + $0x90] ss:$24 sps:$4 sm:$0xff]  }
 0x233   :  { %v550_v61 = vpop.f32.mrf.mxu1  ;;  %v735_v22 = vpop.f32.mrf.mxu0  ;;  %2310 = vmatprep.subr.bf16.mxu1 %v4618_v55  ;;  %2351 = vmatprep.subr.bf16.mxu0 %v4621_v57  ;;  %v4663_v55 = vld [vmem:[%s7037_s5 + $0x394] ss:$24 sps:$4 sm:$0xff]  }
 0x234   :  { %853 = vst [vmem:[%s7038_s7 + $0x8] sm:$0xff] %v550_v61  ;;  %855 = vst [vmem:[%s7038_s7 + $0x18] sm:$0xff] %v735_v22  ;;  %v4666_v22 = vld [vmem:[%s7037_s5 + $0x64] ss:$24 sps:$4 sm:$0xff]  }
 0x235   :  { %v554_v63 = vpop.f32.mrf.mxu1  ;;  %v739_v20 = vpop.f32.mrf.mxu0 }
 0x236   :  { %856 = vst [vmem:[%s7038_s7 + $0x20] sm:$0xff] %v554_v63  ;;  %858 = vst [vmem:[%s7038_s7 + $0x30] sm:$0xff] %v739_v20  ;;  %2311 = vmatpush2.bf16.msra.mxu1 %v4616_v60  ;;  %2352 = vmatpush2.bf16.msra.mxu0 %v4619_v23  ;;  %v4661_v60 = vld [vmem:[%s7037_s5 + $0x390] ss:$24 sps:$4 sm:$0xff]   ;;  %v4664_v20 = vld [vmem:[%s7037_s5 + $0x60] ss:$24 sps:$4 sm:$0xff]  }
 0x237   :  { %v556_v2 = vpop.f32.mrf.mxu1  ;;  %v741_v18 = vpop.f32.mrf.mxu0  ;;  %2312 = vmatprep.subr.bf16.mxu1 %v4624_v62  ;;  %2353 = vmatprep.subr.bf16.mxu0 %v4627_v21  ;;  %v4669_v62 = vld [vmem:[%s7037_s5 + $0x364] ss:$24 sps:$4 sm:$0xff]  }
 0x238   :  { %857 = vst [vmem:[%s7038_s7 + $0x28] sm:$0xff] %v556_v2  ;;  %859 = vst [vmem:[%s7038_s7 + $0x38] sm:$0xff] %v741_v18  ;;  %v4672_v18 = vld [vmem:[%s7037_s5 + $0x34] ss:$24 sps:$4 sm:$0xff]  }
 0x239   :  { %v560_v7 = vpop.f32.mrf.mxu1  ;;  %v745_v16 = vpop.f32.mrf.mxu0 }
 0x23a   :  { %860 = vst [vmem:[%s7038_s7 + $0x40] sm:$0xff] %v560_v7  ;;  %862 = vst [vmem:[%s7038_s7 + $0x50] sm:$0xff] %v745_v16  ;;  %2313 = vmatpush2.bf16.msra.mxu1 %v4622_v0  ;;  %2354 = vmatpush2.bf16.msra.mxu0 %v4625_v19  ;;  %v4667_v0 = vld [vmem:[%s7037_s5 + $0x360] ss:$24 sps:$4 sm:$0xff]   ;;  %v4670_v16 = vld [vmem:[%s7037_s5 + $0x30] ss:$24 sps:$4 sm:$0xff]  }
 0x23b   :  { %v562_v54 = vpop.f32.mrf.mxu1  ;;  %v747_v15 = vpop.f32.mrf.mxu0  ;;  %2314 = vmatprep.subr.bf16.mxu1 %v4630_v5  ;;  %2355 = vmatprep.subr.bf16.mxu0 %v4633_v17  ;;  %v4675_v5 = vld [vmem:[%s7037_s5 + $0x334] ss:$24 sps:$4 sm:$0xff]  }
 0x23c   :  { %861 = vst [vmem:[%s7038_s7 + $0x48] sm:$0xff] %v562_v54  ;;  %863 = vst [vmem:[%s7038_s7 + $0x58] sm:$0xff] %v747_v15  ;;  %v4678_v15 = vld [vmem:[%s7037_s5 + $0x4] ss:$24 sps:$4 sm:$0xff]  }
 0x23d   :  { %v566_v24 = vpop.f32.mrf.mxu1  ;;  %v751_v12 = vpop.f32.mrf.mxu0 }
 0x23e   :  { %864 = vst [vmem:[%s7038_s7 + $0x60] sm:$0xff] %v566_v24  ;;  %866 = vst [vmem:[%s7038_s7 + $0x70] sm:$0xff] %v751_v12  ;;  %2315 = vmatpush2.bf16.msra.mxu1 %v4628_v8  ;;  %2356 = vmatpush2.bf16.msra.mxu0 %v4631_v52  ;;  %v4673_v8 = vld [vmem:[%s7037_s5 + $0x330] ss:$24 sps:$4 sm:$0xff]   ;;  %v4676_v12 = vld [vmem:[%s7037_s5] ss:$24 sps:$4 sm:$0xff]  }
 0x23f   :  { %v568_v27 = vpop.f32.mrf.mxu1  ;;  %v753_v9 = vpop.f32.mrf.mxu0  ;;  %3566 = vmatprep.subr.bf16.mxu1 %v4636_v13  ;;  %3607 = vmatprep.subr.bf16.mxu0 %v4639_v14  ;;  %v4681_v13 = vld [vmem:[%s7037_s5 + $0x304] ss:$24 sps:$4 sm:$0xff]  }
 0x240   :  { %865 = vst [vmem:[%s7038_s7 + $0x68] sm:$0xff] %v568_v27  ;;  %867 = vst [vmem:[%s7038_s7 + $0x78] sm:$0xff] %v753_v9  ;;  %v4684_v9 = vld [vmem:[%s7037_s5 + $0x2d4] ss:$24 sps:$4 sm:$0xff]  }
 0x241   :  { %2317 = vmatmul.mubr.bf16.vlgmr.msra.gmra.mxu1 %v5716_v56  ;;  %2358 = vmatmul.mubr.bf16.vlgmr.msra.gmra.mxu0 %v5721_v58  ;;  %v572_v31 = vpop.f32.mrf.mxu1  ;;  %v757_v32 = vpop.f32.mrf.mxu0  ;;  %v4643_v56 = vld [vmem:[%s7037_s5 + $0x420] ss:$24 sps:$4 sm:$0xff]  }
 0x242   :  { %868 = vst [vmem:[%s7038_s7 + $0x80] sm:$0xff] %v572_v31  ;;  %870 = vst [vmem:[%s7038_s7 + $0x90] sm:$0xff] %v757_v32  ;;  %3567 = vmatpush1.bf16.msra.mxu1 %v4634_v26  ;;  %3608 = vmatpush1.bf16.msra.mxu0 %v4637_v10  ;;  %v4679_v26 = vld [vmem:[%s7037_s5 + $0x300] ss:$24 sps:$4 sm:$0xff]   ;;  %v4682_v32 = vld [vmem:[%s7037_s5 + $0x2d0] ss:$24 sps:$4 sm:$0xff]  }
 0x243   :  { %v574_v58 = vpop.f32.mrf.mxu1  ;;  %v759_v34 = vpop.f32.mrf.mxu0  ;;  %3568 = vmatprep.subr.bf16.mxu1 %v4642_v28  ;;  %3609 = vmatprep.subr.bf16.mxu0 %v4645_v29  ;;  %v4687_v28 = vld [vmem:[%s7037_s5 + $0x5d4] ss:$24 sps:$4 sm:$0xff]  }
 0x244   :  { %869 = vst [vmem:[%s7038_s7 + $0x88] sm:$0xff] %v574_v58  ;;  %871 = vst [vmem:[%s7038_s7 + $0x98] sm:$0xff] %v759_v34  ;;  %3598 = vmatprep.mubr.bf16.mxu1 %v6189_v30  ;;  %3639 = vmatprep.mubr.bf16.mxu0 %v6193_v6  ;;  %v4690_v34 = vld [vmem:[%s7037_s5 + $0x2a4] ss:$24 sps:$4 sm:$0xff]  }
 0x245   :  { %v578_v37 = vpop.f32.mrf.mxu1  ;;  %v763_v38 = vpop.f32.mrf.mxu0 }
 0x246   :  { %872 = vst [vmem:[%s7038_s7 + $0xa0] sm:$0xff] %v578_v37  ;;  %874 = vst [vmem:[%s7038_s7 + $0xb0] sm:$0xff] %v763_v38  ;;  %3569 = vmatpush1.bf16.msra.mxu1 %v4640_v33  ;;  %3610 = vmatpush1.bf16.msra.mxu0 %v4643_v56  ;;  %v4685_v33 = vld [vmem:[%s7037_s5 + $0x5d0] ss:$24 sps:$4 sm:$0xff]   ;;  %v4688_v38 = vld [vmem:[%s7037_s5 + $0x2a0] ss:$24 sps:$4 sm:$0xff]  }
 0x247   :  { %v580_v41 = vpop.f32.mrf.mxu1  ;;  %v765_v42 = vpop.f32.mrf.mxu0  ;;  %3570 = vmatprep.subr.bf16.mxu1 %v4648_v35  ;;  %3611 = vmatprep.subr.bf16.mxu0 %v4651_v36  ;;  %v4693_v35 = vld [vmem:[%s7037_s5 + $0x5a4] ss:$24 sps:$4 sm:$0xff]  }
 0x248   :  { %873 = vst [vmem:[%s7038_s7 + $0xa8] sm:$0xff] %v580_v41  ;;  %875 = vst [vmem:[%s7038_s7 + $0xb8] sm:$0xff] %v765_v42  ;;  %v4696_v42 = vld [vmem:[%s7037_s5 + $0x274] ss:$24 sps:$4 sm:$0xff]  }
 0x249   :  { %v584_v45 = vpop.f32.mrf.mxu1  ;;  %v769_v46 = vpop.f32.mrf.mxu0 }
 0x24a   :  { %876 = vst [vmem:[%s7038_s7 + $0xc0] sm:$0xff] %v584_v45  ;;  %878 = vst [vmem:[%s7038_s7 + $0xd0] sm:$0xff] %v769_v46  ;;  %3571 = vmatpush1.bf16.msra.mxu1 %v4646_v39  ;;  %3612 = vmatpush1.bf16.msra.mxu0 %v4649_v40  ;;  %v4691_v39 = vld [vmem:[%s7037_s5 + $0x5a0] ss:$24 sps:$4 sm:$0xff]   ;;  %v4694_v46 = vld [vmem:[%s7037_s5 + $0x270] ss:$24 sps:$4 sm:$0xff]  }
 0x24b   :  { %v586_v51 = vpop.f32.mrf.mxu1  ;;  %v771_v53 = vpop.f32.mrf.mxu0  ;;  %3572 = vmatprep.subr.bf16.mxu1 %v4654_v43  ;;  %3613 = vmatprep.subr.bf16.mxu0 %v4657_v44  ;;  %v4699_v43 = vld [vmem:[%s7037_s5 + $0x574] ss:$24 sps:$4 sm:$0xff]  }
 0x24c   :  { %877 = vst [vmem:[%s7038_s7 + $0xc8] sm:$0xff] %v586_v51  ;;  %879 = vst [vmem:[%s7038_s7 + $0xd8] sm:$0xff] %v771_v53  ;;  %v4702_v53 = vld [vmem:[%s7037_s5 + $0x244] ss:$24 sps:$4 sm:$0xff]  }
 0x24d   :  { %v590_v57 = vpop.f32.mrf.mxu1  ;;  %v775_v1 = vpop.f32.mrf.mxu0 }
 0x24e   :  { %880 = vst [vmem:[%s7038_s7 + $0xe0] sm:$0xff] %v590_v57  ;;  %882 = vst [vmem:[%s7038_s7 + $0xf0] sm:$0xff] %v775_v1  ;;  %3573 = vmatpush1.bf16.msra.mxu1 %v4652_v47  ;;  %3614 = vmatpush1.bf16.msra.mxu0 %v4655_v48  ;;  %v4697_v47 = vld [vmem:[%s7037_s5 + $0x570] ss:$24 sps:$4 sm:$0xff]   ;;  %v4700_v1 = vld [vmem:[%s7037_s5 + $0x240] ss:$24 sps:$4 sm:$0xff]  }
 0x24f   :  { %v592_v23 = vpop.f32.mrf.mxu1  ;;  %v777_v61 = vpop.f32.mrf.mxu0  ;;  %3574 = vmatprep.subr.bf16.mxu1 %v4660_v3  ;;  %3615 = vmatprep.subr.bf16.mxu0 %v4663_v55  ;;  %v4705_v3 = vld [vmem:[%s7037_s5 + $0x544] ss:$24 sps:$4 sm:$0xff]  }
 0x250   :  { %881 = vst [vmem:[%s7038_s7 + $0xe8] sm:$0xff] %v592_v23  ;;  %883 = vst [vmem:[%s7038_s7 + $0xf8] sm:$0xff] %v777_v61  ;;  %v4708_v61 = vld [vmem:[%s7037_s5 + $0x214] ss:$24 sps:$4 sm:$0xff]  }
 0x251   :  { %v596_v21 = vpop.f32.mrf.mxu1  ;;  %v781_v63 = vpop.f32.mrf.mxu0 }
 0x252   :  { %884 = vst [vmem:[%s7038_s7 + $0x100] sm:$0xff] %v596_v21  ;;  %886 = vst [vmem:[%s7038_s7 + $0x110] sm:$0xff] %v781_v63  ;;  %3575 = vmatpush1.bf16.msra.mxu1 %v4658_v59  ;;  %3616 = vmatpush1.bf16.msra.mxu0 %v4661_v60  ;;  %v4703_v59 = vld [vmem:[%s7037_s5 + $0x540] ss:$24 sps:$4 sm:$0xff]   ;;  %v4706_v63 = vld [vmem:[%s7037_s5 + $0x210] ss:$24 sps:$4 sm:$0xff]  }
 0x253   :  { %v598_v19 = vpop.f32.mrf.mxu1  ;;  %v783_v2 = vpop.f32.mrf.mxu0  ;;  %3576 = vmatprep.subr.bf16.mxu1 %v4666_v22  ;;  %3617 = vmatprep.subr.bf16.mxu0 %v4669_v62  ;;  %v4711_v22 = vld [vmem:[%s7037_s5 + $0x514] ss:$24 sps:$4 sm:$0xff]  }
 0x254   :  { %885 = vst [vmem:[%s7038_s7 + $0x108] sm:$0xff] %v598_v19  ;;  %887 = vst [vmem:[%s7038_s7 + $0x118] sm:$0xff] %v783_v2  ;;  %v4714_v2 = vld [vmem:[%s7037_s5 + $0x1e4] ss:$24 sps:$4 sm:$0xff]  }
 0x255   :  { %v602_v17 = vpop.f32.mrf.mxu1  ;;  %v787_v7 = vpop.f32.mrf.mxu0 }
 0x256   :  { %888 = vst [vmem:[%s7038_s7 + $0x120] sm:$0xff] %v602_v17  ;;  %890 = vst [vmem:[%s7038_s7 + $0x130] sm:$0xff] %v787_v7  ;;  %3577 = vmatpush1.bf16.msra.mxu1 %v4664_v20  ;;  %3618 = vmatpush1.bf16.msra.mxu0 %v4667_v0  ;;  %v4709_v20 = vld [vmem:[%s7037_s5 + $0x510] ss:$24 sps:$4 sm:$0xff]   ;;  %v4712_v7 = vld [vmem:[%s7037_s5 + $0x1e0] ss:$24 sps:$4 sm:$0xff]  }
 0x257   :  { %v604_v52 = vpop.f32.mrf.mxu1  ;;  %v789_v54 = vpop.f32.mrf.mxu0  ;;  %3578 = vmatprep.subr.bf16.mxu1 %v4672_v18  ;;  %3619 = vmatprep.subr.bf16.mxu0 %v4675_v5  ;;  %v4717_v18 = vld [vmem:[%s7037_s5 + $0x4e4] ss:$24 sps:$4 sm:$0xff]  }
 0x258   :  { %889 = vst [vmem:[%s7038_s7 + $0x128] sm:$0xff] %v604_v52  ;;  %891 = vst [vmem:[%s7038_s7 + $0x138] sm:$0xff] %v789_v54  ;;  %v4720_v54 = vld [vmem:[%s7037_s5 + $0x1b4] ss:$24 sps:$4 sm:$0xff]  }
 0x259   :  { %v608_v14 = vpop.f32.mrf.mxu1  ;;  %v793_v24 = vpop.f32.mrf.mxu0 }
 0x25a   :  { %892 = vst [vmem:[%s7038_s7 + $0x140] sm:$0xff] %v608_v14  ;;  %894 = vst [vmem:[%s7038_s7 + $0x150] sm:$0xff] %v793_v24  ;;  %3579 = vmatpush1.bf16.msra.mxu1 %v4670_v16  ;;  %3620 = vmatpush1.bf16.msra.mxu0 %v4673_v8  ;;  %v4715_v16 = vld [vmem:[%s7037_s5 + $0x4e0] ss:$24 sps:$4 sm:$0xff]   ;;  %v4718_v24 = vld [vmem:[%s7037_s5 + $0x1b0] ss:$24 sps:$4 sm:$0xff]  }
 0x25b   :  { %v610_v10 = vpop.f32.mrf.mxu1  ;;  %v795_v27 = vpop.f32.mrf.mxu0  ;;  %3580 = vmatprep.subr.bf16.mxu1 %v4678_v15  ;;  %3621 = vmatprep.subr.bf16.mxu0 %v4681_v13  ;;  %v4723_v15 = vld [vmem:[%s7037_s5 + $0x4b4] ss:$24 sps:$4 sm:$0xff]  }
 0x25c   :  { %893 = vst [vmem:[%s7038_s7 + $0x148] sm:$0xff] %v610_v10  ;;  %895 = vst [vmem:[%s7038_s7 + $0x158] sm:$0xff] %v795_v27  ;;  %v4726_v27 = vld [vmem:[%s7037_s5 + $0x184] ss:$24 sps:$4 sm:$0xff]  }
 0x25d   :  { %v614_v29 = vpop.f32.mrf.mxu1  ;;  %v799_v31 = vpop.f32.mrf.mxu0 }
 0x25e   :  { %896 = vst [vmem:[%s7038_s7 + $0x160] sm:$0xff] %v614_v29  ;;  %898 = vst [vmem:[%s7038_s7 + $0x170] sm:$0xff] %v799_v31  ;;  %3581 = vmatpush1.bf16.msra.mxu1 %v4676_v12  ;;  %3622 = vmatpush1.bf16.msra.mxu0 %v4679_v26  ;;  %v4721_v12 = vld [vmem:[%s7037_s5 + $0x4b0] ss:$24 sps:$4 sm:$0xff]   ;;  %v4724_v31 = vld [vmem:[%s7037_s5 + $0x180] ss:$24 sps:$4 sm:$0xff]  }
 0x25f   :  { %v616_v56 = vpop.f32.mrf.mxu1  ;;  %v801_v58 = vpop.f32.mrf.mxu0  ;;  %3582 = vmatprep.subr.bf16.mxu1 %v4684_v9  ;;  %3623 = vmatprep.subr.bf16.mxu0 %v4687_v28  ;;  %v4729_v9 = vld [vmem:[%s7037_s5 + $0x484] ss:$24 sps:$4 sm:$0xff]  }
 0x260   :  { %897 = vst [vmem:[%s7038_s7 + $0x168] sm:$0xff] %v616_v56  ;;  %899 = vst [vmem:[%s7038_s7 + $0x178] sm:$0xff] %v801_v58  ;;  %v4736_v58 = vld [vmem:[%s7037_s5 + $0x15c] ss:$24 sps:$4 sm:$0xff]  }
 0x261   :  { %v620_v36 = vpop.f32.mrf.mxu1  ;;  %v805_v37 = vpop.f32.mrf.mxu0 }
 0x262   :  { %900 = vst [vmem:[%s7038_s7 + $0x180] sm:$0xff] %v620_v36  ;;  %902 = vst [vmem:[%s7038_s7 + $0x190] sm:$0xff] %v805_v37  ;;  %3583 = vmatpush2.bf16.msra.mxu1 %v4682_v32  ;;  %3624 = vmatpush2.bf16.msra.mxu0 %v4685_v33  ;;  %v4727_v32 = vld [vmem:[%s7037_s5 + $0x480] ss:$24 sps:$4 sm:$0xff]  }
 0x263   :  { %v622_v40 = vpop.f32.mrf.mxu1  ;;  %v807_v41 = vpop.f32.mrf.mxu0  ;;  %3584 = vmatprep.subr.bf16.mxu1 %v4690_v34  ;;  %3625 = vmatprep.subr.bf16.mxu0 %v4693_v35  ;;  %v4739_v34 = vld [vmem:[%s7037_s5 + $0x45c] ss:$24 sps:$4 sm:$0xff]   ;;  %v6556_v35 = vld [vmem:[%s7040_s4] sm:$0x3f] }
 0x264   :  { %901 = vst [vmem:[%s7038_s7 + $0x188] sm:$0xff] %v622_v40  ;;  %903 = vst [vmem:[%s7038_s7 + $0x198] sm:$0xff] %v807_v41  ;;  %v4734_v40 = vld [vmem:[%s7037_s5 + $0x158] ss:$24 sps:$4 sm:$0xff]  }
 0x265   :  { %v626_v44 = vpop.f32.mrf.mxu1  ;;  %v811_v45 = vpop.f32.mrf.mxu0 }
 0x266   :  { %904 = vst [vmem:[%s7038_s7 + $0x1a0] sm:$0xff] %v626_v44  ;;  %906 = vst [vmem:[%s7038_s7 + $0x1b0] sm:$0xff] %v811_v45  ;;  %3585 = vmatpush2.bf16.msra.mxu1 %v4688_v38  ;;  %3626 = vmatpush2.bf16.msra.mxu0 %v4691_v39  ;;  %v6566_v38 = vcombine.low %v6156_v25, %v6156_v25  ;;  %v6570_v39 = vcombine.low %v6161_v11, %v6161_v11  ;;  %v4737_v25 = vld [vmem:[%s7037_s5 + $0x458] ss:$24 sps:$4 sm:$0xff]   ;;  %v4745_v44 = vld [vmem:[%s7037_s5 + $0x42c] ss:$24 sps:$4 sm:$0xff]  }
 0x267   :  { %v628_v48 = vpop.f32.mrf.mxu1  ;;  %v813_v51 = vpop.f32.mrf.mxu0  ;;  %3586 = vmatprep.subr.bf16.mxu1 %v4696_v42  ;;  %3627 = vmatprep.subr.bf16.mxu0 %v4699_v43  ;;  %v1133_v11 = vrot.slane %v6556_v35, %v5355_v49  ;;  %v4742_v43 = vld [vmem:[%s7037_s5 + $0x12c] ss:$24 sps:$4 sm:$0xff]   ;;  %v1137_v45 = vrot.slane %v6556_v35, %v5358_v50 }
 0x268   :  { %905 = vst [vmem:[%s7038_s7 + $0x1a8] sm:$0xff] %v628_v48  ;;  %907 = vst [vmem:[%s7038_s7 + $0x1b8] sm:$0xff] %v813_v51  ;;  %v4740_v51 = vld [vmem:[%s7037_s5 + $0x128] ss:$24 sps:$4 sm:$0xff]  }
 0x269   :  { %v632_v55 = vpop.f32.mrf.mxu1  ;;  %v817_v57 = vpop.f32.mrf.mxu0 }
 0x26a   :  { %908 = vst [vmem:[%s7038_s7 + $0x1c0] sm:$0xff] %v632_v55  ;;  %910 = vst [vmem:[%s7038_s7 + $0x1d0] sm:$0xff] %v817_v57  ;;  %3587 = vmatpush2.bf16.msra.mxu1 %v4694_v46  ;;  %3628 = vmatpush2.bf16.msra.mxu0 %v4697_v47  ;;  %v4748_v57 = vld [vmem:[%s7037_s5 + $0xfc] ss:$24 sps:$4 sm:$0xff]  }
 0x26b   :  { %v634_v60 = vpop.f32.mrf.mxu1  ;;  %v819_v23 = vpop.f32.mrf.mxu0  ;;  %3588 = vmatprep.subr.bf16.mxu1 %v4702_v53  ;;  %3629 = vmatprep.subr.bf16.mxu0 %v4705_v3  ;;  %v4743_v53 = vld [vmem:[%s7037_s5 + $0x428] ss:$24 sps:$4 sm:$0xff]  }
 0x26c   :  { %909 = vst [vmem:[%s7038_s7 + $0x1c8] sm:$0xff] %v634_v60  ;;  %911 = vst [vmem:[%s7038_s7 + $0x1d8] sm:$0xff] %v819_v23 }
 0x26d   :  { %v638_v62 = vpop.f32.mrf.mxu1  ;;  %v823_v21 = vpop.f32.mrf.mxu0 }
 0x26e   :  { %912 = vst [vmem:[%s7038_s7 + $0x1e0] sm:$0xff] %v638_v62  ;;  %914 = vst [vmem:[%s7038_s7 + $0x1f0] sm:$0xff] %v823_v21  ;;  %3589 = vmatpush2.bf16.msra.mxu1 %v4700_v1  ;;  %3630 = vmatpush2.bf16.msra.mxu0 %v4703_v59  ;;  %v4751_v1 = vld [vmem:[%s7037_s5 + $0x3fc] ss:$24 sps:$4 sm:$0xff]   ;;  %v4746_v62 = vld [vmem:[%s7037_s5 + $0xf8] ss:$24 sps:$4 sm:$0xff]  }
 0x26f   :  { %v640_v0 = vpop.f32.mrf.mxu1  ;;  %v825_v19 = vpop.f32.mrf.mxu0  ;;  %3590 = vmatprep.subr.bf16.mxu1 %v4708_v61  ;;  %3631 = vmatprep.subr.bf16.mxu0 %v4711_v22  ;;  %v4749_v21 = vld [vmem:[%s7037_s5 + $0x3f8] ss:$24 sps:$4 sm:$0xff]  }
 0x270   :  { %913 = vst [vmem:[%s7038_s7 + $0x1e8] sm:$0xff] %v640_v0  ;;  %915 = vst [vmem:[%s7038_s7 + $0x1f8] sm:$0xff] %v825_v19  ;;  %v4754_v0 = vld [vmem:[%s7037_s5 + $0xcc] ss:$24 sps:$4 sm:$0xff]  }
 0x271   :  { %v644_v5 = vpop.f32.mrf.mxu1  ;;  %v829_v17 = vpop.f32.mrf.mxu0  ;;  %v4757_v19 = vld [vmem:[%s7037_s5 + $0x3cc] ss:$24 sps:$4 sm:$0xff]  }
 0x272   :  { %916 = vst [vmem:[%s7038_s7 + $0x200] sm:$0xff] %v644_v5  ;;  %918 = vst [vmem:[%s7038_s7 + $0x210] sm:$0xff] %v829_v17  ;;  %3591 = vmatpush2.bf16.msra.mxu1 %v4706_v63  ;;  %3632 = vmatpush2.bf16.msra.mxu0 %v4709_v20  ;;  %v4760_v5 = vld [vmem:[%s7037_s5 + $0x9c] ss:$24 sps:$4 sm:$0xff]  }
 0x273   :  { %v646_v8 = vpop.f32.mrf.mxu1  ;;  %v831_v52 = vpop.f32.mrf.mxu0  ;;  %3592 = vmatprep.subr.bf16.mxu1 %v4714_v2  ;;  %3633 = vmatprep.subr.bf16.mxu0 %v4717_v18  ;;  %v4752_v2 = vld [vmem:[%s7037_s5 + $0xc8] ss:$24 sps:$4 sm:$0xff]   ;;  %v4763_v17 = vld [vmem:[%s7037_s5 + $0x39c] ss:$24 sps:$4 sm:$0xff]  }
 0x274   :  { %917 = vst [vmem:[%s7038_s7 + $0x208] sm:$0xff] %v646_v8  ;;  %919 = vst [vmem:[%s7038_s7 + $0x218] sm:$0xff] %v831_v52  ;;  %v4755_v18 = vld [vmem:[%s7037_s5 + $0x3c8] ss:$24 sps:$4 sm:$0xff]   ;;  %v4766_v8 = vld [vmem:[%s7037_s5 + $0x6c] ss:$24 sps:$4 sm:$0xff]  }
 0x275   :  { %v650_v13 = vpop.f32.mrf.mxu1  ;;  %v835_v14 = vpop.f32.mrf.mxu0  ;;  %v4769_v52 = vld [vmem:[%s7037_s5 + $0x36c] ss:$24 sps:$4 sm:$0xff]  }
 0x276   :  { %920 = vst [vmem:[%s7038_s7 + $0x220] sm:$0xff] %v650_v13  ;;  %922 = vst [vmem:[%s7038_s7 + $0x230] sm:$0xff] %v835_v14  ;;  %3593 = vmatpush2.bf16.msra.mxu1 %v4712_v7  ;;  %3634 = vmatpush2.bf16.msra.mxu0 %v4715_v16  ;;  %v4758_v7 = vld [vmem:[%s7037_s5 + $0x98] ss:$24 sps:$4 sm:$0xff]   ;;  %v4772_v13 = vld [vmem:[%s7037_s5 + $0x3c] ss:$24 sps:$4 sm:$0xff]  }
 0x277   :  { %v652_v26 = vpop.f32.mrf.mxu1  ;;  %v837_v10 = vpop.f32.mrf.mxu0  ;;  %3594 = vmatprep.subr.bf16.mxu1 %v4720_v54  ;;  %3635 = vmatprep.subr.bf16.mxu0 %v4723_v15  ;;  %v4761_v16 = vld [vmem:[%s7037_s5 + $0x398] ss:$24 sps:$4 sm:$0xff]   ;;  %v4764_v54 = vld [vmem:[%s7037_s5 + $0x68] ss:$24 sps:$4 sm:$0xff]   ;;  %v4775_v14 = vld [vmem:[%s7037_s5 + $0x33c] ss:$24 sps:$4 sm:$0xff]  }
 0x278   :  { %921 = vst [vmem:[%s7038_s7 + $0x228] sm:$0xff] %v652_v26  ;;  %923 = vst [vmem:[%s7038_s7 + $0x238] sm:$0xff] %v837_v10  ;;  %v4767_v15 = vld [vmem:[%s7037_s5 + $0x368] ss:$24 sps:$4 sm:$0xff]   ;;  %v4778_v26 = vld [vmem:[%s7037_s5 + $0xc] ss:$24 sps:$4 sm:$0xff]  }
 0x279   :  { %v656_v28 = vpop.f32.mrf.mxu1  ;;  %v841_v29 = vpop.f32.mrf.mxu0  ;;  %v4781_v10 = vld [vmem:[%s7037_s5 + $0x30c] ss:$24 sps:$4 sm:$0xff]  }
 0x27a   :  { %924 = vst [vmem:[%s7038_s7 + $0x240] sm:$0xff] %v656_v28  ;;  %926 = vst [vmem:[%s7038_s7 + $0x250] sm:$0xff] %v841_v29  ;;  %3595 = vmatpush2.bf16.msra.mxu1 %v4718_v24  ;;  %3636 = vmatpush2.bf16.msra.mxu0 %v4721_v12  ;;  %v4770_v24 = vld [vmem:[%s7037_s5 + $0x38] ss:$24 sps:$4 sm:$0xff]   ;;  %v4784_v28 = vld [vmem:[%s7037_s5 + $0x2dc] ss:$24 sps:$4 sm:$0xff]  }
 0x27b   :  { %v658_v33 = vpop.f32.mrf.mxu1  ;;  %v843_v56 = vpop.f32.mrf.mxu0  ;;  %3596 = vmatprep.subr.bf16.mxu1 %v4726_v27  ;;  %3637 = vmatprep.subr.bf16.mxu0 %v4729_v9  ;;  %v4773_v12 = vld [vmem:[%s7037_s5 + $0x338] ss:$24 sps:$4 sm:$0xff]   ;;  %v4776_v27 = vld [vmem:[%s7037_s5 + $0x8] ss:$24 sps:$4 sm:$0xff]   ;;  %v4787_v29 = vld [vmem:[%s7037_s5 + $0x5dc] ss:$24 sps:$4 sm:$0xff]  }
 0x27c   :  { %925 = vst [vmem:[%s7038_s7 + $0x248] sm:$0xff] %v658_v33  ;;  %927 = vst [vmem:[%s7038_s7 + $0x258] sm:$0xff] %v843_v56  ;;  %v4779_v9 = vld [vmem:[%s7037_s5 + $0x308] ss:$24 sps:$4 sm:$0xff]   ;;  %v4790_v33 = vld [vmem:[%s7037_s5 + $0x2ac] ss:$24 sps:$4 sm:$0xff]  }
 0x27d   :  { %v662_v36 = vpop.f32.mrf.mxu1  ;;  %v847_v37 = vpop.f32.mrf.mxu0  ;;  %v4793_v56 = vld [vmem:[%s7037_s5 + $0x5ac] ss:$24 sps:$4 sm:$0xff]  }
 0x27e   :  { %928 = vst [vmem:[%s7038_s7 + $0x260] sm:$0xff] %v662_v36  ;;  %930 = vst [vmem:[%s7038_s7 + $0x270] sm:$0xff] %v847_v37  ;;  %3597 = vmatpush2.bf16.msra.mxu1 %v4724_v31  ;;  %3638 = vmatpush2.bf16.msra.mxu0 %v4727_v32  ;;  %v4782_v31 = vld [vmem:[%s7037_s5 + $0x2d8] ss:$24 sps:$4 sm:$0xff]   ;;  %v4796_v36 = vld [vmem:[%s7037_s5 + $0x27c] ss:$24 sps:$4 sm:$0xff]  }
 0x27f   :  { %v664_v41 = vpop.f32.mrf.mxu1  ;;  %v849_v42 = vpop.f32.mrf.mxu0  ;;  %3648 = vmatprep.subr.bf16.mxu1 %v4736_v58  ;;  %3689 = vmatprep.subr.bf16.mxu0 %v4739_v34  ;;  %v4785_v32 = vld [vmem:[%s7037_s5 + $0x5d8] ss:$24 sps:$4 sm:$0xff]   ;;  %v4788_v58 = vld [vmem:[%s7037_s5 + $0x2a8] ss:$24 sps:$4 sm:$0xff]   ;;  %v4799_v37 = vld [vmem:[%s7037_s5 + $0x57c] ss:$24 sps:$4 sm:$0xff]  }
 0x280   :  { %929 = vst [vmem:[%s7038_s7 + $0x268] sm:$0xff] %v664_v41  ;;  %931 = vst [vmem:[%s7038_s7 + $0x278] sm:$0xff] %v849_v42  ;;  %v4791_v34 = vld [vmem:[%s7037_s5 + $0x5a8] ss:$24 sps:$4 sm:$0xff]   ;;  %v4805_v41 = vld [vmem:[%s7037_s5 + $0x54c] ss:$24 sps:$4 sm:$0xff]  }
 0x281   :  { %3599 = vmatmul.mubr.bf16.vlgmr.msra.gmra.mxu1 %v6566_v38  ;;  %3640 = vmatmul.mubr.bf16.vlgmr.msra.gmra.mxu0 %v6570_v39  ;;  %v2154_v46 = vpop.f32.mrf.mxu1  ;;  %v2195_v47 = vpop.f32.mrf.mxu0  ;;  %v4800_v42 = vld [vmem:[%s7037_s5 + $0x248] ss:$24 sps:$4 sm:$0xff]  }
 0x282   :  { %v2155_v48 = vadd.f32 %v2154_v46, %v1133_v11  ;;  %3649 = vmatpush1.bf16.msra.mxu1 %v4734_v40  ;;  %3690 = vmatpush1.bf16.msra.mxu0 %v4737_v25  ;;  %v4794_v40 = vld [vmem:[%s7037_s5 + $0x278] ss:$24 sps:$4 sm:$0xff]   ;;  %v4802_v11 = vld [vmem:[%s7037_s5 + $0x24c] ss:$24 sps:$4 sm:$0xff]  }
 0x283   :  { %v2156_v3 = vpop.f32.mrf.mxu1  ;;  %v2197_v55 = vpop.f32.mrf.mxu0  ;;  %3650 = vmatprep.subr.bf16.mxu1 %v4742_v43  ;;  %3691 = vmatprep.subr.bf16.mxu0 %v4745_v44  ;;  %v4797_v25 = vld [vmem:[%s7037_s5 + $0x578] ss:$24 sps:$4 sm:$0xff]   ;;  %v4803_v43 = vld [vmem:[%s7037_s5 + $0x548] ss:$24 sps:$4 sm:$0xff]   ;;  %v4808_v44 = vld [vmem:[%s7037_s5 + $0x21c] ss:$24 sps:$4 sm:$0xff]  }
 0x284   :  { %v2196_v59 = vadd.f32 %v2195_v47, %v2155_v48  ;;  %v2157_v60 = vadd.f32 %v2156_v3, %v1137_v45  ;;  %3680 = vmatprep.mubr.bf16.mxu1 %v6189_v30  ;;  %3721 = vmatprep.mubr.bf16.mxu0 %v6193_v6  ;;  %v4811_v45 = vld [vmem:[%s7037_s5 + $0x51c] ss:$24 sps:$4 sm:$0xff]   ;;  %v4806_v46 = vld [vmem:[%s7037_s5 + $0x218] ss:$24 sps:$4 sm:$0xff]   ;;  %v4814_v48 = vld [vmem:[%s7037_s5 + $0x1ec] ss:$24 sps:$4 sm:$0xff]  }
 0x285   :  { %v2158_v23 = vpop.f32.mrf.mxu1  ;;  %v2199_v61 = vpop.f32.mrf.mxu0  ;;  %v4809_v47 = vld [vmem:[%s7037_s5 + $0x518] ss:$24 sps:$4 sm:$0xff]   ;;  %v4815_v3 = vld [vmem:[%s7037_s5 + $0x4e8] ss:$24 sps:$4 sm:$0xff]  }
 0x286   :  { %3812 = vst [vmem:[%s7041_s9] sm:$0xff] %v2196_v59  ;;  %v2198_v22 = vadd.f32 %v2197_v55, %v2157_v60  ;;  %3651 = vmatpush1.bf16.msra.mxu1 %v4740_v51  ;;  %3692 = vmatpush1.bf16.msra.mxu0 %v4743_v53  ;;  %v4817_v51 = vld [vmem:[%s7037_s5 + $0x4ec] ss:$24 sps:$4 sm:$0xff]   ;;  %v4812_v53 = vld [vmem:[%s7037_s5 + $0x1e8] ss:$24 sps:$4 sm:$0xff]   ;;  %v4820_v55 = vld [vmem:[%s7037_s5 + $0x1bc] ss:$24 sps:$4 sm:$0xff]  }
 0x287   :  { %v2159_v63 = vpop.f32.mrf.mxu1  ;;  %v2200_v20 = vpop.f32.mrf.mxu0  ;;  %3652 = vmatprep.subr.bf16.mxu1 %v4748_v57  ;;  %3693 = vmatprep.subr.bf16.mxu0 %v4751_v1  ;;  %v4823_v57 = vld [vmem:[%s7037_s5 + $0x4bc] ss:$24 sps:$4 sm:$0xff]   ;;  %v4818_v1 = vld [vmem:[%s7037_s5 + $0x1b8] ss:$24 sps:$4 sm:$0xff]   ;;  %v4826_v60 = vld [vmem:[%s7037_s5 + $0x18c] ss:$24 sps:$4 sm:$0xff]  }
 0x288   :  { %3813 = vst [vmem:[%s7041_s9 + $0x8] sm:$0xff] %v2198_v22  ;;  %v4821_v59 = vld [vmem:[%s7037_s5 + $0x4b8] ss:$24 sps:$4 sm:$0xff]   ;;  %v4829_v23 = vld [vmem:[%s7037_s5 + $0x48c] ss:$24 sps:$4 sm:$0xff]   ;;  %v1144_v20 = vsub.s32 3, %v4992_v4 }
 0x289   :  { %v4824_v61 = vld [vmem:[%s7037_s5 + $0x188] ss:$24 sps:$4 sm:$0xff]   ;;  %v4835_v63 = vld [vmem:[%s7037_s5 + $0x464] ss:$24 sps:$4 sm:$0xff]  }
 0x28a   :  { %3653 = vmatpush1.bf16.msra.mxu1 %v4746_v62  ;;  %3694 = vmatpush1.bf16.msra.mxu0 %v4749_v21  ;;  %v4827_v22 = vld [vmem:[%s7037_s5 + $0x488] ss:$24 sps:$4 sm:$0xff]   ;;  %v1140_v62 = vsub.s32 2, %v4992_v4  ;;  %v4832_v21 = vld [vmem:[%s7037_s5 + $0x164] ss:$24 sps:$4 sm:$0xff]  }
 0x28b   :  { %3654 = vmatprep.subr.bf16.mxu1 %v4754_v0  ;;  %3695 = vmatprep.subr.bf16.mxu0 %v4757_v19  ;;  %v4830_v19 = vld [vmem:[%s7037_s5 + $0x160] ss:$24 sps:$4 sm:$0xff]  }
 0x28c   :  { %v1141_v0 = vrot.slane %v6556_v35, %v1140_v62 }
 0x28e   :  { %3655 = vmatpush1.bf16.msra.mxu1 %v4752_v2  ;;  %3696 = vmatpush1.bf16.msra.mxu0 %v4755_v18  ;;  %v4833_v2 = vld [vmem:[%s7037_s5 + $0x460] ss:$24 sps:$4 sm:$0xff]   ;;  %v4838_v18 = vld [vmem:[%s7037_s5 + $0x134] ss:$24 sps:$4 sm:$0xff]  }
 0x28f   :  { %3656 = vmatprep.subr.bf16.mxu1 %v4760_v5  ;;  %3697 = vmatprep.subr.bf16.mxu0 %v4763_v17  ;;  %v4841_v5 = vld [vmem:[%s7037_s5 + $0x434] ss:$24 sps:$4 sm:$0xff]   ;;  %v1145_v17 = vrot.slane %v6556_v35, %v1144_v20 }
 0x292   :  { %3657 = vmatpush1.bf16.msra.mxu1 %v4758_v7  ;;  %3698 = vmatpush1.bf16.msra.mxu0 %v4761_v16 }
 0x293   :  { %3658 = vmatprep.subr.bf16.mxu1 %v4766_v8  ;;  %3699 = vmatprep.subr.bf16.mxu0 %v4769_v52  ;;  %v4836_v52 = vld [vmem:[%s7037_s5 + $0x130] ss:$24 sps:$4 sm:$0xff]  }
 0x296   :  { %3659 = vmatpush1.bf16.msra.mxu1 %v4764_v54  ;;  %3700 = vmatpush1.bf16.msra.mxu0 %v4767_v15  ;;  %v4839_v54 = vld [vmem:[%s7037_s5 + $0x430] ss:$24 sps:$4 sm:$0xff]  }
 0x297   :  { %3660 = vmatprep.subr.bf16.mxu1 %v4772_v13  ;;  %3701 = vmatprep.subr.bf16.mxu0 %v4775_v14  ;;  %v4844_v14 = vld [vmem:[%s7037_s5 + $0x104] ss:$24 sps:$4 sm:$0xff]  }
 0x29a   :  { %3661 = vmatpush1.bf16.msra.mxu1 %v4770_v24  ;;  %3702 = vmatpush1.bf16.msra.mxu0 %v4773_v12  ;;  %v4847_v24 = vld [vmem:[%s7037_s5 + $0x404] ss:$24 sps:$4 sm:$0xff]  }
 0x29b   :  { %3662 = vmatprep.subr.bf16.mxu1 %v4778_v26  ;;  %3703 = vmatprep.subr.bf16.mxu0 %v4781_v10 }
 0x29e   :  { %3663 = vmatpush1.bf16.msra.mxu1 %v4776_v27  ;;  %3704 = vmatpush1.bf16.msra.mxu0 %v4779_v9 }
 0x29f   :  { %3664 = vmatprep.subr.bf16.mxu1 %v4784_v28  ;;  %3705 = vmatprep.subr.bf16.mxu0 %v4787_v29  ;;  %v4842_v28 = vld [vmem:[%s7037_s5 + $0x100] ss:$24 sps:$4 sm:$0xff]  }
 0x2a0   :  { %v4845_v29 = vld [vmem:[%s7037_s5 + $0x400] ss:$24 sps:$4 sm:$0xff]  }
 0x2a2   :  { %3665 = vmatpush2.bf16.msra.mxu1 %v4782_v31  ;;  %3706 = vmatpush2.bf16.msra.mxu0 %v4785_v32  ;;  %v4853_v32 = vld [vmem:[%s7037_s5 + $0x3d4] ss:$24 sps:$4 sm:$0xff]  }
 0x2a3   :  { %3666 = vmatprep.subr.bf16.mxu1 %v4790_v33  ;;  %3707 = vmatprep.subr.bf16.mxu0 %v4793_v56  ;;  %v4848_v33 = vld [vmem:[%s7037_s5 + $0xd0] ss:$24 sps:$4 sm:$0xff]  }
 0x2a4   :  { %v4851_v56 = vld [vmem:[%s7037_s5 + $0x3d0] ss:$24 sps:$4 sm:$0xff]  }
 0x2a6   :  { %3667 = vmatpush2.bf16.msra.mxu1 %v4788_v58  ;;  %3708 = vmatpush2.bf16.msra.mxu0 %v4791_v34  ;;  %v4856_v58 = vld [vmem:[%s7037_s5 + $0xa4] ss:$24 sps:$4 sm:$0xff]  }
 0x2a7   :  { %3668 = vmatprep.subr.bf16.mxu1 %v4796_v36  ;;  %3709 = vmatprep.subr.bf16.mxu0 %v4799_v37  ;;  %v4859_v34 = vld [vmem:[%s7037_s5 + $0x3a4] ss:$24 sps:$4 sm:$0xff]   ;;  %v4854_v36 = vld [vmem:[%s7037_s5 + $0xa0] ss:$24 sps:$4 sm:$0xff]  }
 0x2a8   :  { %v4857_v37 = vld [vmem:[%s7037_s5 + $0x3a0] ss:$24 sps:$4 sm:$0xff]  }
 0x2aa   :  { %3669 = vmatpush2.bf16.msra.mxu1 %v4794_v40  ;;  %3710 = vmatpush2.bf16.msra.mxu0 %v4797_v25  ;;  %v4862_v40 = vld [vmem:[%s7037_s5 + $0x74] ss:$24 sps:$4 sm:$0xff]  }
 0x2ab   :  { %3670 = vmatprep.subr.bf16.mxu1 %v4802_v11  ;;  %3711 = vmatprep.subr.bf16.mxu0 %v4805_v41  ;;  %v4865_v25 = vld [vmem:[%s7037_s5 + $0x374] ss:$24 sps:$4 sm:$0xff]   ;;  %v4860_v11 = vld [vmem:[%s7037_s5 + $0x70] ss:$24 sps:$4 sm:$0xff]  }
 0x2ac   :  { %v4863_v41 = vld [vmem:[%s7037_s5 + $0x370] ss:$24 sps:$4 sm:$0xff]  }
 0x2ae   :  { %3671 = vmatpush2.bf16.msra.mxu1 %v4800_v42  ;;  %3712 = vmatpush2.bf16.msra.mxu0 %v4803_v43  ;;  %v4868_v42 = vld [vmem:[%s7037_s5 + $0x44] ss:$24 sps:$4 sm:$0xff]  }
 0x2af   :  { %3672 = vmatprep.subr.bf16.mxu1 %v4808_v44  ;;  %3713 = vmatprep.subr.bf16.mxu0 %v4811_v45  ;;  %v4871_v43 = vld [vmem:[%s7037_s5 + $0x344] ss:$24 sps:$4 sm:$0xff]   ;;  %v4866_v44 = vld [vmem:[%s7037_s5 + $0x40] ss:$24 sps:$4 sm:$0xff]  }
 0x2b0   :  { %v4869_v45 = vld [vmem:[%s7037_s5 + $0x340] ss:$24 sps:$4 sm:$0xff]  }
 0x2b2   :  { %3673 = vmatpush2.bf16.msra.mxu1 %v4806_v46  ;;  %3714 = vmatpush2.bf16.msra.mxu0 %v4809_v47  ;;  %v4874_v46 = vld [vmem:[%s7037_s5 + $0x14] ss:$24 sps:$4 sm:$0xff]  }
 0x2b3   :  { %3674 = vmatprep.subr.bf16.mxu1 %v4814_v48  ;;  %3715 = vmatprep.subr.bf16.mxu0 %v4817_v51  ;;  %v4877_v47 = vld [vmem:[%s7037_s5 + $0x314] ss:$24 sps:$4 sm:$0xff]   ;;  %v4872_v48 = vld [vmem:[%s7037_s5 + $0x10] ss:$24 sps:$4 sm:$0xff]  }
 0x2b4   :  { %v4875_v51 = vld [vmem:[%s7037_s5 + $0x310] ss:$24 sps:$4 sm:$0xff]  }
 0x2b6   :  { %3675 = vmatpush2.bf16.msra.mxu1 %v4812_v53  ;;  %3716 = vmatpush2.bf16.msra.mxu0 %v4815_v3  ;;  %v4880_v53 = vld [vmem:[%s7037_s5 + $0x2e4] ss:$24 sps:$4 sm:$0xff]  }
 0x2b7   :  { %3676 = vmatprep.subr.bf16.mxu1 %v4820_v55  ;;  %3717 = vmatprep.subr.bf16.mxu0 %v4823_v57  ;;  %v4883_v3 = vld [vmem:[%s7037_s5 + $0x5e4] ss:$24 sps:$4 sm:$0xff]   ;;  %v4878_v55 = vld [vmem:[%s7037_s5 + $0x2e0] ss:$24 sps:$4 sm:$0xff]  }
 0x2b8   :  { %v4881_v57 = vld [vmem:[%s7037_s5 + $0x5e0] ss:$24 sps:$4 sm:$0xff]  }
 0x2ba   :  { %3677 = vmatpush2.bf16.msra.mxu1 %v4818_v1  ;;  %3718 = vmatpush2.bf16.msra.mxu0 %v4821_v59  ;;  %v4886_v1 = vld [vmem:[%s7037_s5 + $0x2b4] ss:$24 sps:$4 sm:$0xff]  }
 0x2bb   :  { %3678 = vmatprep.subr.bf16.mxu1 %v4826_v60  ;;  %3719 = vmatprep.subr.bf16.mxu0 %v4829_v23  ;;  %v4889_v59 = vld [vmem:[%s7037_s5 + $0x5b4] ss:$24 sps:$4 sm:$0xff]   ;;  %v4884_v60 = vld [vmem:[%s7037_s5 + $0x2b0] ss:$24 sps:$4 sm:$0xff]  }
 0x2bc   :  { %v4887_v23 = vld [vmem:[%s7037_s5 + $0x5b0] ss:$24 sps:$4 sm:$0xff]  }
 0x2be   :  { %3679 = vmatpush2.bf16.msra.mxu1 %v4824_v61  ;;  %3720 = vmatpush2.bf16.msra.mxu0 %v4827_v22  ;;  %v4892_v61 = vld [vmem:[%s7037_s5 + $0x284] ss:$24 sps:$4 sm:$0xff]  }
 0x2bf   :  { %3730 = vmatprep.subr.bf16.mxu1 %v4832_v21  ;;  %3771 = vmatprep.subr.bf16.mxu0 %v4835_v63  ;;  %v4895_v22 = vld [vmem:[%s7037_s5 + $0x584] ss:$24 sps:$4 sm:$0xff]   ;;  %v4890_v21 = vld [vmem:[%s7037_s5 + $0x280] ss:$24 sps:$4 sm:$0xff]  }
 0x2c0   :  { %v4893_v63 = vld [vmem:[%s7037_s5 + $0x580] ss:$24 sps:$4 sm:$0xff]  }
 0x2c1   :  { %v2236_v7 = vpop.f32.mrf.mxu1  ;;  %v2277_v16 = vpop.f32.mrf.mxu0  ;;  %3681 = vmatmul.mubr.bf16.vlgmr.msra.gmra.mxu1 %v6566_v38  ;;  %3722 = vmatmul.mubr.bf16.vlgmr.msra.gmra.mxu0 %v6570_v39 }
 0x2c2   :  { %v2237_v8 = vadd.f32 %v2236_v7, %v1141_v0  ;;  %3731 = vmatpush1.bf16.msra.mxu1 %v4830_v19  ;;  %3772 = vmatpush1.bf16.msra.mxu0 %v4833_v2  ;;  %v4898_v0 = vld [vmem:[%s7037_s5 + $0x254] ss:$24 sps:$4 sm:$0xff]   ;;  %v4896_v2 = vld [vmem:[%s7037_s5 + $0x250] ss:$24 sps:$4 sm:$0xff]   ;;  %v4902_v7 = vld [vmem:[%s7037_s5 + $0x220] ss:$24 sps:$4 sm:$0xff]  }
 0x2c3   :  { %v2238_v15 = vpop.f32.mrf.mxu1  ;;  %v2279_v13 = vpop.f32.mrf.mxu0  ;;  %3732 = vmatprep.subr.bf16.mxu1 %v4838_v18  ;;  %3773 = vmatprep.subr.bf16.mxu0 %v4841_v5  ;;  %v4901_v19 = vld [vmem:[%s7037_s5 + $0x554] ss:$24 sps:$4 sm:$0xff]   ;;  %v4899_v18 = vld [vmem:[%s7037_s5 + $0x550] ss:$24 sps:$4 sm:$0xff]   ;;  %v4904_v5 = vld [vmem:[%s7037_s5 + $0x224] ss:$24 sps:$4 sm:$0xff]  }
 0x2c4   :  { %v2278_v12 = vadd.f32 %v2277_v16, %v2237_v8  ;;  %v2239_v26 = vadd.f32 %v2238_v15, %v1145_v17  ;;  %3762 = vmatprep.mubr.bf16.mxu1 %v6189_v30  ;;  %3803 = vmatprep.mubr.bf16.mxu0 %v6193_v6  ;;  %v4850_v6 = vld [vmem:[%s7037_s5 + $0xd4] ss:$24 sps:$4 sm:$0xff]   ;;  %v4907_v17 = vld [vmem:[%s7037_s5 + $0x524] ss:$24 sps:$4 sm:$0xff]   ;;  %v4905_v16 = vld [vmem:[%s7037_s5 + $0x520] ss:$24 sps:$4 sm:$0xff]  }
 0x2c5   :  { %v2240_v10 = vpop.f32.mrf.mxu1  ;;  %v2281_v27 = vpop.f32.mrf.mxu0  ;;  %v4910_v8 = vld [vmem:[%s7037_s5 + $0x1f4] ss:$24 sps:$4 sm:$0xff]   ;;  %v4911_v15 = vld [vmem:[%s7037_s5 + $0x4f0] ss:$24 sps:$4 sm:$0xff]  }
 0x2c6   :  { %3814 = vst [vmem:[%s7041_s9 + $0x10] sm:$0xff] %v2278_v12  ;;  %v2280_v9 = vadd.f32 %v2279_v13, %v2239_v26  ;;  %3733 = vmatpush1.bf16.msra.mxu1 %v4836_v52  ;;  %3774 = vmatpush1.bf16.msra.mxu0 %v4839_v54  ;;  %v4913_v52 = vld [vmem:[%s7037_s5 + $0x4f4] ss:$24 sps:$4 sm:$0xff]   ;;  %v4908_v54 = vld [vmem:[%s7037_s5 + $0x1f0] ss:$24 sps:$4 sm:$0xff]  }
 0x2c7   :  { %v2241_v30 = vpop.f32.mrf.mxu1  ;;  %v2282_v31 = vpop.f32.mrf.mxu0  ;;  %3734 = vmatprep.subr.bf16.mxu1 %v4844_v14  ;;  %3775 = vmatprep.subr.bf16.mxu0 %v4847_v24  ;;  %v4916_v13 = vld [vmem:[%s7037_s5 + $0x1c4] ss:$24 sps:$4 sm:$0xff]   ;;  %v4914_v24 = vld [vmem:[%s7037_s5 + $0x1c0] ss:$24 sps:$4 sm:$0xff]   ;;  %v4922_v26 = vld [vmem:[%s7037_s5 + $0x194] ss:$24 sps:$4 sm:$0xff]  }
 0x2c8   :  { %3815 = vst [vmem:[%s7041_s9 + $0x18] sm:$0xff] %v2280_v9  ;;  %v4919_v14 = vld [vmem:[%s7037_s5 + $0x4c4] ss:$24 sps:$4 sm:$0xff]   ;;  %v4917_v12 = vld [vmem:[%s7037_s5 + $0x4c0] ss:$24 sps:$4 sm:$0xff]  }
 0x2c9   :  { %v4925_v10 = vld [vmem:[%s7037_s5 + $0x494] ss:$24 sps:$4 sm:$0xff]   ;;  %v4920_v27 = vld [vmem:[%s7037_s5 + $0x190] ss:$24 sps:$4 sm:$0xff]  }
 0x2ca   :  { %3735 = vmatpush1.bf16.msra.mxu1 %v4842_v28  ;;  %3776 = vmatpush1.bf16.msra.mxu0 %v4845_v29  ;;  %v4923_v9 = vld [vmem:[%s7037_s5 + $0x490] ss:$24 sps:$4 sm:$0xff]   ;;  %v1148_v28 = vsub.s32 4, %v4992_v4  ;;  %v1152_v29 = vsub.s32 5, %v4992_v4 }
 0x2cb   :  { %3736 = vmatprep.subr.bf16.mxu1 %v4850_v6  ;;  %3777 = vmatprep.subr.bf16.mxu0 %v4853_v32 }
 0x2cc   :  { %v1149_v30 = vrot.slane %v6556_v35, %v1148_v28  ;;  %v1153_v31 = vrot.slane %v6556_v35, %v1152_v29 }
 0x2ce   :  { %3737 = vmatpush1.bf16.msra.mxu1 %v4848_v33  ;;  %3778 = vmatpush1.bf16.msra.mxu0 %v4851_v56 }
 0x2cf   :  { %3738 = vmatprep.subr.bf16.mxu1 %v4856_v58  ;;  %3779 = vmatprep.subr.bf16.mxu0 %v4859_v34 }
 0x2d2   :  { %3739 = vmatpush1.bf16.msra.mxu1 %v4854_v36  ;;  %3780 = vmatpush1.bf16.msra.mxu0 %v4857_v37 }
 0x2d3   :  { %3740 = vmatprep.subr.bf16.mxu1 %v4862_v40  ;;  %3781 = vmatprep.subr.bf16.mxu0 %v4865_v25 }
 0x2d6   :  { %3741 = vmatpush1.bf16.msra.mxu1 %v4860_v11  ;;  %3782 = vmatpush1.bf16.msra.mxu0 %v4863_v41 }
 0x2d7   :  { %3742 = vmatprep.subr.bf16.mxu1 %v4868_v42  ;;  %3783 = vmatprep.subr.bf16.mxu0 %v4871_v43 }
 0x2da   :  { %3743 = vmatpush1.bf16.msra.mxu1 %v4866_v44  ;;  %3784 = vmatpush1.bf16.msra.mxu0 %v4869_v45 }
 0x2db   :  { %3744 = vmatprep.subr.bf16.mxu1 %v4874_v46  ;;  %3785 = vmatprep.subr.bf16.mxu0 %v4877_v47 }
 0x2de   :  { %3745 = vmatpush1.bf16.msra.mxu1 %v4872_v48  ;;  %3786 = vmatpush1.bf16.msra.mxu0 %v4875_v51 }
 0x2df   :  { %3746 = vmatprep.subr.bf16.mxu1 %v4880_v53  ;;  %3787 = vmatprep.subr.bf16.mxu0 %v4883_v3 }
 0x2e2   :  { %3747 = vmatpush2.bf16.msra.mxu1 %v4878_v55  ;;  %3788 = vmatpush2.bf16.msra.mxu0 %v4881_v57 }
 0x2e3   :  { %3748 = vmatprep.subr.bf16.mxu1 %v4886_v1  ;;  %3789 = vmatprep.subr.bf16.mxu0 %v4889_v59 }
 0x2e6   :  { %3749 = vmatpush2.bf16.msra.mxu1 %v4884_v60  ;;  %3790 = vmatpush2.bf16.msra.mxu0 %v4887_v23 }
 0x2e7   :  { %3750 = vmatprep.subr.bf16.mxu1 %v4892_v61  ;;  %3791 = vmatprep.subr.bf16.mxu0 %v4895_v22 }
 0x2ea   :  { %3751 = vmatpush2.bf16.msra.mxu1 %v4890_v21  ;;  %3792 = vmatpush2.bf16.msra.mxu0 %v4893_v63 }
 0x2eb   :  { %3752 = vmatprep.subr.bf16.mxu1 %v4898_v0  ;;  %3793 = vmatprep.subr.bf16.mxu0 %v4901_v19 }
 0x2ee   :  { %3753 = vmatpush2.bf16.msra.mxu1 %v4896_v2  ;;  %3794 = vmatpush2.bf16.msra.mxu0 %v4899_v18 }
 0x2ef   :  { %3754 = vmatprep.subr.bf16.mxu1 %v4904_v5  ;;  %3795 = vmatprep.subr.bf16.mxu0 %v4907_v17 }
 0x2f2   :  { %3755 = vmatpush2.bf16.msra.mxu1 %v4902_v7  ;;  %3796 = vmatpush2.bf16.msra.mxu0 %v4905_v16 }
 0x2f3   :  { %3756 = vmatprep.subr.bf16.mxu1 %v4910_v8  ;;  %3797 = vmatprep.subr.bf16.mxu0 %v4913_v52 }
 0x2f6   :  { %3757 = vmatpush2.bf16.msra.mxu1 %v4908_v54  ;;  %3798 = vmatpush2.bf16.msra.mxu0 %v4911_v15 }
 0x2f7   :  { %3758 = vmatprep.subr.bf16.mxu1 %v4916_v13  ;;  %3799 = vmatprep.subr.bf16.mxu0 %v4919_v14 }
 0x2fa   :  { %3759 = vmatpush2.bf16.msra.mxu1 %v4914_v24  ;;  %3800 = vmatpush2.bf16.msra.mxu0 %v4917_v12 }
 0x2fb   :  { %3760 = vmatprep.subr.bf16.mxu1 %v4922_v26  ;;  %3801 = vmatprep.subr.bf16.mxu0 %v4925_v10 }
 0x2fe   :  { %3761 = vmatpush2.bf16.msra.mxu1 %v4920_v27  ;;  %3802 = vmatpush2.bf16.msra.mxu0 %v4923_v9 }
 0x301   :  { %v2318_v6 = vpop.f32.mrf.mxu1  ;;  %v2359_v32 = vpop.f32.mrf.mxu0  ;;  %3763 = vmatmul.mubr.bf16.vlgmr.msra.gmra.mxu1 %v6566_v38  ;;  %3804 = vmatmul.mubr.bf16.vlgmr.msra.gmra.mxu0 %v6570_v39  ;;  %v2560_v38 = vld [vmem:[%s7042_s6] sm:$0x3f] }
 0x302   :  { %v2319_v33 = vadd.f32 %v2318_v6, %v1149_v30  ;;  %v2565_v39 = vrot.slane %v2560_v38, %v5355_v49  ;;  %v2569_v41 = vrot.slane %v2560_v38, %v5358_v50  ;;  %v2573_v49 = vrot.slane %v2560_v38, %v1140_v62 }
 0x303   :  { %v2320_v56 = vpop.f32.mrf.mxu1  ;;  %v2361_v58 = vpop.f32.mrf.mxu0  ;;  %v2577_v50 = vrot.slane %v2560_v38, %v1144_v20  ;;  %v2581_v4 = vrot.slane %v2560_v38, %v1148_v28  ;;  %v2585_v62 = vrot.slane %v2560_v38, %v1152_v29 }
 0x304   :  { %v2360_v34 = vadd.f32 %v2359_v32, %v2319_v33  ;;  %v2321_v36 = vadd.f32 %v2320_v56, %v1153_v31 }
 0x305   :  { %v2322_v37 = vpop.f32.mrf.mxu1  ;;  %v2363_v40 = vpop.f32.mrf.mxu0 }
 0x306   :  { %3816 = vst [vmem:[%s7041_s9 + $0x20] sm:$0xff] %v2360_v34  ;;  %v2362_v25 = vadd.f32 %v2361_v58, %v2321_v36 }
 0x307   :  { %v2323_v11 = vpop.f32.mrf.mxu1  ;;  %v2364_v35 = vpop.f32.mrf.mxu0 }
 0x308   :  { %3817 = vst [vmem:[%s7041_s9 + $0x28] sm:$0xff] %v2362_v25 }
 0x341   :  { %v3600_v42 = vpop.f32.mrf.mxu1  ;;  %v3641_v43 = vpop.f32.mrf.mxu0 }
 0x342   :  { %v3601_v44 = vadd.f32 %v3600_v42, %v2565_v39 }
 0x343   :  { %v3602_v45 = vpop.f32.mrf.mxu1  ;;  %v3643_v46 = vpop.f32.mrf.mxu0 }
 0x344   :  { %v3642_v47 = vadd.f32 %v3641_v43, %v3601_v44  ;;  %v3603_v48 = vadd.f32 %v3602_v45, %v2569_v41 }
 0x345   :  { %v3604_v51 = vpop.f32.mrf.mxu1  ;;  %v3645_v53 = vpop.f32.mrf.mxu0 }
 0x346   :  { %3818 = vst [vmem:[%s7041_s9 + $0x30] sm:$0xff] %v3642_v47  ;;  %v3644_v3 = vadd.f32 %v3643_v46, %v3603_v48 }
 0x347   :  { %v3605_v55 = vpop.f32.mrf.mxu1  ;;  %v3646_v57 = vpop.f32.mrf.mxu0 }
 0x348   :  { %3819 = vst [vmem:[%s7041_s9 + $0x38] sm:$0xff] %v3644_v3 }
 0x381   :  { %v3682_v1 = vpop.f32.mrf.mxu1  ;;  %v3723_v59 = vpop.f32.mrf.mxu0 }
 0x382   :  { %v3683_v60 = vadd.f32 %v3682_v1, %v2573_v49 }
 0x383   :  { %v3684_v23 = vpop.f32.mrf.mxu1  ;;  %v3725_v61 = vpop.f32.mrf.mxu0 }
 0x384   :  { %v3724_v22 = vadd.f32 %v3723_v59, %v3683_v60  ;;  %v3685_v21 = vadd.f32 %v3684_v23, %v2577_v50 }
 0x385   :  { %v3686_v63 = vpop.f32.mrf.mxu1  ;;  %v3727_v0 = vpop.f32.mrf.mxu0 }
 0x386   :  { %3820 = vst [vmem:[%s7041_s9 + $0x40] sm:$0xff] %v3724_v22  ;;  %v3726_v19 = vadd.f32 %v3725_v61, %v3685_v21 }
 0x387   :  { %v3687_v2 = vpop.f32.mrf.mxu1  ;;  %v3728_v18 = vpop.f32.mrf.mxu0 }
 0x388   :  { %3821 = vst [vmem:[%s7041_s9 + $0x48] sm:$0xff] %v3726_v19 }
 0x3c1   :  { %v3764_v20 = vpop.f32.mrf.mxu1  ;;  %v3805_v5 = vpop.f32.mrf.mxu0 }
 0x3c2   :  { %v3765_v17 = vadd.f32 %v3764_v20, %v2581_v4 }
 0x3c3   :  { %v3766_v7 = vpop.f32.mrf.mxu1  ;;  %v3807_v16 = vpop.f32.mrf.mxu0 }
 0x3c4   :  { %v3806_v8 = vadd.f32 %v3805_v5, %v3765_v17  ;;  %v3767_v52 = vadd.f32 %v3766_v7, %v2585_v62 }
 0x3c5   :  { %v3768_v54 = vpop.f32.mrf.mxu1  ;;  %v3809_v15 = vpop.f32.mrf.mxu0 }
 0x3c6   :  { %3822 = vst [vmem:[%s7041_s9 + $0x50] sm:$0xff] %v3806_v8  ;;  %v3808_v13 = vadd.f32 %v3807_v16, %v3767_v52 }
 0x3c7   :  { %v3769_v14 = vpop.f32.mrf.mxu1  ;;  %v3810_v24 = vpop.f32.mrf.mxu0 }
 0x3c8   :  { %3823 = vst [vmem:[%s7041_s9 + $0x58] sm:$0xff] %v3808_v13 }

</bundles_post_ra>
